<compile_context>
chip_gen: v7x
topology: tpu7x:2x2x1
jax: 0.10.0
libtpu: 0.0.40
codegen_flags: <defaults>
</compile_context>

<pallas_src>
import math
from functools import partial

import jax
import jax.numpy as jnp
from jax import lax
from jax.experimental import pallas as pl
from jax.experimental.pallas import tpu as pltpu


# ---------------------------------------------------------------------------
# Fused depthwise (k x k, groups=Cin) + pointwise (1x1) convolution kernel
# ---------------------------------------------------------------------------
def _dwsep_kernel(x_ref, wdw_ref, bdw_ref, wpw_ref, bpw_ref, o_ref, *,
                  ksize, stride, ho, wo):
    """One batch image, one Cout tile.

    x_ref   : (1, Hp, Wp, Cin)  zero-padded input, channels on lanes, fp32
    wdw_ref : (k*k, Cin)        depthwise weights, tap-major, fp32
    bdw_ref : (1, Cin)          depthwise bias, fp32
    wpw_ref : (Cin, TN)         pointwise weight tile, bf16 (native MXU rate)
    bpw_ref : (1, TN)           pointwise bias tile, fp32
    o_ref   : (1, Ho*Wo, TN)    output tile, fp32 (TN lane-dense when possible)
    """
    cin = x_ref.shape[3]
    wdw = wdw_ref[...]                                    # (k*k, Cin)

    # Depthwise conv: k*k shifted (strided) reads from the VMEM tile,
    # VPU multiply-accumulate in fp32.  k is static -> fully unrolled.
    acc = jnp.zeros((ho, wo, cin), jnp.float32)
    for ky in range(ksize):
        for kx in range(ksize):
            if stride == 1:
                tap = x_ref[0, ky:ky + ho, kx:kx + wo, :]
            else:
                tap = x_ref[0, pl.ds(ky, ho, stride), pl.ds(kx, wo, stride), :]
            acc = acc + tap * wdw[ky * ksize + kx]        # (Cin,) lane broadcast
    acc = acc + bdw_ref[...]                              # (1, Cin) broadcast, fp32

    # Pointwise 1x1 conv == matmul over channels on the MXU.
    # bf16 operands, fp32 accumulation; bias epilogue in fp32.
    dw = acc.reshape(ho * wo, cin).astype(jnp.bfloat16)   # (M, K)
    out = jnp.dot(dw, wpw_ref[...], preferred_element_type=jnp.float32)
    out = out + bpw_ref[...]                              # (1, TN) broadcast
    o_ref[0] = out.astype(o_ref.dtype)


def _choose_tile_n(cout):
    # Lane-dense output tiles: prefer multiples of 128 (full lanes, unmasked vst).
    for tn in (256, 128):
        if cout % tn == 0:
            return tn
    return cout  # small / odd Cout: single full-extent tile


def depthwise_sep_conv2d(x, w_dw, b_dw, w_pw, b_pw, *, kernel_size,
                         padding=0, stride=1):
    """DepthWiseConv2d forward.  x: (B, Cin, H, W) NCHW -> (B, Cout, Ho, Wo)."""
    B, Cin, H, W = x.shape
    k = kernel_size
    w_dw = w_dw.reshape(Cin, -1)                 # accepts torch (Cin, 1, k, k)
    Cout = w_pw.shape[0]
    w_pw = w_pw.reshape(Cout, Cin)               # accepts torch (Cout, Cin, 1, 1)
    Ho = (H + 2 * padding - k) // stride + 1
    Wo = (W + 2 * padding - k) // stride + 1

    if b_dw is None:
        b_dw = jnp.zeros((Cin,), jnp.float32)
    if b_pw is None:
        b_pw = jnp.zeros((Cout,), jnp.float32)

    # The conv's own spatial zero padding + channels-last layout (lanes = Cin).
    xp = jnp.pad(x.astype(jnp.float32),
                 ((0, 0), (0, 0), (padding, padding), (padding, padding)))
    xp = xp.transpose(0, 2, 3, 1)                        # (B, Hp, Wp, Cin)
    Hp, Wp = xp.shape[1], xp.shape[2]

    wdw = w_dw.T.astype(jnp.float32)                     # (k*k, Cin)
    bdw = b_dw.reshape(1, Cin).astype(jnp.float32)
    wpw = w_pw.T.astype(jnp.bfloat16)                    # (Cin, Cout), bf16 for MXU
    bpw = b_pw.reshape(1, Cout).astype(jnp.float32)

    tn = _choose_tile_n(Cout)
    grid = (B, Cout // tn)
    # TODO(synk): tile over output rows (overlapping input windows) if a single
    #             padded feature map ever exceeds the VMEM budget; not needed at
    #             lightweight_gan resolutions.

    out = pl.pallas_call(
        partial(_dwsep_kernel, ksize=k, stride=stride, ho=Ho, wo=Wo),
        out_shape=jax.ShapeDtypeStruct((B, Ho * Wo, Cout), jnp.float32),
        grid_spec=pltpu.PrefetchScalarGridSpec(
            num_scalar_prefetch=0,
            grid=grid,
            in_specs=[
                pl.BlockSpec((1, Hp, Wp, Cin), lambda b, j: (b, 0, 0, 0)),
                pl.BlockSpec((k * k, Cin), lambda b, j: (0, 0)),
                pl.BlockSpec((1, Cin), lambda b, j: (0, 0)),
                pl.BlockSpec((Cin, tn), lambda b, j: (0, j)),
                pl.BlockSpec((1, tn), lambda b, j: (0, j)),
            ],
            out_specs=pl.BlockSpec((1, Ho * Wo, tn), lambda b, j: (b, 0, j)),
        ),
        compiler_params=pltpu.CompilerParams(
            dimension_semantics=("parallel", "parallel"),
        ),
    )(xp, wdw, bdw, wpw, bpw)

    # NCHW public layout (wrapper-side layout plumbing on the small final tensor).
    return out.reshape(B, Ho, Wo, Cout).transpose(0, 3, 1, 2)


# ---------------------------------------------------------------------------
# Pure-JAX reference (XLA convs) for correctness checking
# ---------------------------------------------------------------------------
def _reference(x, w_dw, b_dw, w_pw, b_pw, *, kernel_size, padding, stride):
    Cin = x.shape[1]
    Cout = w_pw.shape[0]
    dn = ("NCHW", "OIHW", "NCHW")
    dw = lax.conv_general_dilated(
        x, w_dw.reshape(Cin, 1, kernel_size, kernel_size),
        window_strides=(stride, stride),
        padding=[(padding, padding), (padding, padding)],
        dimension_numbers=dn, feature_group_count=Cin)
    dw = dw + b_dw.reshape(1, Cin, 1, 1)
    out = lax.conv_general_dilated(
        dw, w_pw.reshape(Cout, Cin, 1, 1), (1, 1), [(0, 0), (0, 0)],
        dimension_numbers=dn)
    return out + b_pw.reshape(1, Cout, 1, 1)


if __name__ == "__main__":
    key = jax.random.PRNGKey(0)
    kx, k1, k2, k3, k4 = jax.random.split(key, 5)

    # Shapes consistent with lightweight_gan usage: DepthWiseConv2d(dim, 2*inner, 3, padding=1)
    B, Cin, Cout, H, W = 2, 64, 128, 16, 16
    ksz, pad, st = 3, 1, 1

    x = jax.random.normal(kx, (B, Cin, H, W), jnp.float32)
    w_dw = jax.random.normal(k1, (Cin, 1, ksz, ksz), jnp.float32) / ksz
    b_dw = 0.1 * jax.random.normal(k2, (Cin,), jnp.float32)
    w_pw = jax.random.normal(k3, (Cout, Cin, 1, 1), jnp.float32) / math.sqrt(Cin)
    b_pw = 0.1 * jax.random.normal(k4, (Cout,), jnp.float32)

    fwd = jax.jit(partial(depthwise_sep_conv2d, kernel_size=ksz,
                          padding=pad, stride=st))
    out = fwd(x, w_dw, b_dw, w_pw, b_pw)
    jax.block_until_ready(out)

    ref = _reference(x, w_dw, b_dw, w_pw, b_pw,
                     kernel_size=ksz, padding=pad, stride=st)

    assert out.shape == (B, Cout, H, W), out.shape
    assert bool(jnp.all(jnp.isfinite(out)))
    rel_err = float(jnp.max(jnp.abs(out - ref)) / (jnp.max(jnp.abs(ref)) + 1e-6))
    assert rel_err < 5e-2, rel_err   # bf16 MXU inputs, fp32 accumulation
    print("KERNEL_OK")
</pallas_src>

<mosaic_0001>
module attributes {stable_mosaic.version = 11 : i64} {
  func.func @_dwsep_kernel(%arg0: i32, %arg1: i32, %arg2: memref<1x18x18x64xf32, #tpu.memory_space<vmem>>, %arg3: memref<9x64xf32, #tpu.memory_space<vmem>>, %arg4: memref<1x64xf32, #tpu.memory_space<vmem>>, %arg5: memref<64x128xbf16, #tpu.memory_space<vmem>>, %arg6: memref<1x128xf32, #tpu.memory_space<vmem>>, %arg7: memref<1x256x128xf32, #tpu.memory_space<vmem>>) attributes {dimension_semantics = [#tpu.dimension_semantics<parallel>, #tpu.dimension_semantics<parallel>], iteration_bounds = array<i64: 2, 1>, scalar_prefetch = 0 : i64, scratch_operands = 0 : i64, tpu.core_type = #tpu.core_type<tc>, window_params = [{transform_indices = @transform_0, window_bounds = array<i64: 1, 18, 18, 64>}, {pipeline_mode = #tpu.pipeline_mode<synchronous>, transform_indices = @transform_1, window_bounds = array<i64: 9, 64>}, {pipeline_mode = #tpu.pipeline_mode<synchronous>, transform_indices = @transform_2, window_bounds = array<i64: 1, 64>}, {transform_indices = @transform_3, window_bounds = array<i64: 64, 128>}, {transform_indices = @transform_4, window_bounds = array<i64: 1, 128>}, {transform_indices = @transform_5, window_bounds = array<i64: 1, 256, 128>}]} {
    %c0 = arith.constant 0 : index
    %c0_0 = arith.constant 0 : index
    %0 = vector.load %arg3[%c0, %c0_0] : memref<9x64xf32, #tpu.memory_space<vmem>>, vector<9x64xf32>
    %cst = arith.constant 0.000000e+00 : f32
    %1 = vector.broadcast %cst : f32 to vector<16x16x64xf32>
    %c0_1 = arith.constant 0 : index
    %c0_2 = arith.constant 0 : index
    %c0_3 = arith.constant 0 : index
    %c0_4 = arith.constant 0 : index
    %2 = vector.load %arg2[%c0_1, %c0_2, %c0_3, %c0_4] : memref<1x18x18x64xf32, #tpu.memory_space<vmem>>, vector<1x16x16x64xf32>
    %3 = vector.shape_cast %2 : vector<1x16x16x64xf32> to vector<16x16x64xf32>
    %4 = vector.extract_strided_slice %0 {offsets = [0, 0], sizes = [1, 64], strides = [1, 1]} : vector<9x64xf32> to vector<1x64xf32>
    %5 = vector.shape_cast %4 : vector<1x64xf32> to vector<64xf32>
    %6 = vector.shape_cast %5 : vector<64xf32> to vector<1x1x64xf32>
    %7 = vector.broadcast %6 : vector<1x1x64xf32> to vector<16x16x64xf32>
    %8 = arith.mulf %3, %7 : vector<16x16x64xf32>
    %9 = arith.addf %1, %8 : vector<16x16x64xf32>
    %c0_5 = arith.constant 0 : index
    %c0_6 = arith.constant 0 : index
    %c1 = arith.constant 1 : index
    %c0_7 = arith.constant 0 : index
    %10 = vector.load %arg2[%c0_5, %c0_6, %c1, %c0_7] : memref<1x18x18x64xf32, #tpu.memory_space<vmem>>, vector<1x16x16x64xf32>
    %11 = vector.shape_cast %10 : vector<1x16x16x64xf32> to vector<16x16x64xf32>
    %12 = vector.extract_strided_slice %0 {offsets = [1, 0], sizes = [1, 64], strides = [1, 1]} : vector<9x64xf32> to vector<1x64xf32>
    %13 = vector.shape_cast %12 : vector<1x64xf32> to vector<64xf32>
    %14 = vector.shape_cast %13 : vector<64xf32> to vector<1x1x64xf32>
    %15 = vector.broadcast %14 : vector<1x1x64xf32> to vector<16x16x64xf32>
    %16 = arith.mulf %11, %15 : vector<16x16x64xf32>
    %17 = arith.addf %9, %16 : vector<16x16x64xf32>
    %c0_8 = arith.constant 0 : index
    %c0_9 = arith.constant 0 : index
    %c2 = arith.constant 2 : index
    %c0_10 = arith.constant 0 : index
    %18 = vector.load %arg2[%c0_8, %c0_9, %c2, %c0_10] : memref<1x18x18x64xf32, #tpu.memory_space<vmem>>, vector<1x16x16x64xf32>
    %19 = vector.shape_cast %18 : vector<1x16x16x64xf32> to vector<16x16x64xf32>
    %20 = vector.extract_strided_slice %0 {offsets = [2, 0], sizes = [1, 64], strides = [1, 1]} : vector<9x64xf32> to vector<1x64xf32>
    %21 = vector.shape_cast %20 : vector<1x64xf32> to vector<64xf32>
    %22 = vector.shape_cast %21 : vector<64xf32> to vector<1x1x64xf32>
    %23 = vector.broadcast %22 : vector<1x1x64xf32> to vector<16x16x64xf32>
    %24 = arith.mulf %19, %23 : vector<16x16x64xf32>
    %25 = arith.addf %17, %24 : vector<16x16x64xf32>
    %c0_11 = arith.constant 0 : index
    %c1_12 = arith.constant 1 : index
    %c0_13 = arith.constant 0 : index
    %c0_14 = arith.constant 0 : index
    %26 = vector.load %arg2[%c0_11, %c1_12, %c0_13, %c0_14] : memref<1x18x18x64xf32, #tpu.memory_space<vmem>>, vector<1x16x16x64xf32>
    %27 = vector.shape_cast %26 : vector<1x16x16x64xf32> to vector<16x16x64xf32>
    %28 = vector.extract_strided_slice %0 {offsets = [3, 0], sizes = [1, 64], strides = [1, 1]} : vector<9x64xf32> to vector<1x64xf32>
    %29 = vector.shape_cast %28 : vector<1x64xf32> to vector<64xf32>
    %30 = vector.shape_cast %29 : vector<64xf32> to vector<1x1x64xf32>
    %31 = vector.broadcast %30 : vector<1x1x64xf32> to vector<16x16x64xf32>
    %32 = arith.mulf %27, %31 : vector<16x16x64xf32>
    %33 = arith.addf %25, %32 : vector<16x16x64xf32>
    %c0_15 = arith.constant 0 : index
    %c1_16 = arith.constant 1 : index
    %c1_17 = arith.constant 1 : index
    %c0_18 = arith.constant 0 : index
    %34 = vector.load %arg2[%c0_15, %c1_16, %c1_17, %c0_18] : memref<1x18x18x64xf32, #tpu.memory_space<vmem>>, vector<1x16x16x64xf32>
    %35 = vector.shape_cast %34 : vector<1x16x16x64xf32> to vector<16x16x64xf32>
    %36 = vector.extract_strided_slice %0 {offsets = [4, 0], sizes = [1, 64], strides = [1, 1]} : vector<9x64xf32> to vector<1x64xf32>
    %37 = vector.shape_cast %36 : vector<1x64xf32> to vector<64xf32>
    %38 = vector.shape_cast %37 : vector<64xf32> to vector<1x1x64xf32>
    %39 = vector.broadcast %38 : vector<1x1x64xf32> to vector<16x16x64xf32>
    %40 = arith.mulf %35, %39 : vector<16x16x64xf32>
    %41 = arith.addf %33, %40 : vector<16x16x64xf32>
    %c0_19 = arith.constant 0 : index
    %c1_20 = arith.constant 1 : index
    %c2_21 = arith.constant 2 : index
    %c0_22 = arith.constant 0 : index
    %42 = vector.load %arg2[%c0_19, %c1_20, %c2_21, %c0_22] : memref<1x18x18x64xf32, #tpu.memory_space<vmem>>, vector<1x16x16x64xf32>
    %43 = vector.shape_cast %42 : vector<1x16x16x64xf32> to vector<16x16x64xf32>
    %44 = vector.extract_strided_slice %0 {offsets = [5, 0], sizes = [1, 64], strides = [1, 1]} : vector<9x64xf32> to vector<1x64xf32>
    %45 = vector.shape_cast %44 : vector<1x64xf32> to vector<64xf32>
    %46 = vector.shape_cast %45 : vector<64xf32> to vector<1x1x64xf32>
    %47 = vector.broadcast %46 : vector<1x1x64xf32> to vector<16x16x64xf32>
    %48 = arith.mulf %43, %47 : vector<16x16x64xf32>
    %49 = arith.addf %41, %48 : vector<16x16x64xf32>
    %c0_23 = arith.constant 0 : index
    %c2_24 = arith.constant 2 : index
    %c0_25 = arith.constant 0 : index
    %c0_26 = arith.constant 0 : index
    %50 = vector.load %arg2[%c0_23, %c2_24, %c0_25, %c0_26] : memref<1x18x18x64xf32, #tpu.memory_space<vmem>>, vector<1x16x16x64xf32>
    %51 = vector.shape_cast %50 : vector<1x16x16x64xf32> to vector<16x16x64xf32>
    %52 = vector.extract_strided_slice %0 {offsets = [6, 0], sizes = [1, 64], strides = [1, 1]} : vector<9x64xf32> to vector<1x64xf32>
    %53 = vector.shape_cast %52 : vector<1x64xf32> to vector<64xf32>
    %54 = vector.shape_cast %53 : vector<64xf32> to vector<1x1x64xf32>
    %55 = vector.broadcast %54 : vector<1x1x64xf32> to vector<16x16x64xf32>
    %56 = arith.mulf %51, %55 : vector<16x16x64xf32>
    %57 = arith.addf %49, %56 : vector<16x16x64xf32>
    %c0_27 = arith.constant 0 : index
    %c2_28 = arith.constant 2 : index
    %c1_29 = arith.constant 1 : index
    %c0_30 = arith.constant 0 : index
    %58 = vector.load %arg2[%c0_27, %c2_28, %c1_29, %c0_30] : memref<1x18x18x64xf32, #tpu.memory_space<vmem>>, vector<1x16x16x64xf32>
    %59 = vector.shape_cast %58 : vector<1x16x16x64xf32> to vector<16x16x64xf32>
    %60 = vector.extract_strided_slice %0 {offsets = [7, 0], sizes = [1, 64], strides = [1, 1]} : vector<9x64xf32> to vector<1x64xf32>
    %61 = vector.shape_cast %60 : vector<1x64xf32> to vector<64xf32>
    %62 = vector.shape_cast %61 : vector<64xf32> to vector<1x1x64xf32>
    %63 = vector.broadcast %62 : vector<1x1x64xf32> to vector<16x16x64xf32>
    %64 = arith.mulf %59, %63 : vector<16x16x64xf32>
    %65 = arith.addf %57, %64 : vector<16x16x64xf32>
    %c0_31 = arith.constant 0 : index
    %c2_32 = arith.constant 2 : index
    %c2_33 = arith.constant 2 : index
    %c0_34 = arith.constant 0 : index
    %66 = vector.load %arg2[%c0_31, %c2_32, %c2_33, %c0_34] : memref<1x18x18x64xf32, #tpu.memory_space<vmem>>, vector<1x16x16x64xf32>
    %67 = vector.shape_cast %66 : vector<1x16x16x64xf32> to vector<16x16x64xf32>
    %68 = vector.extract_strided_slice %0 {offsets = [8, 0], sizes = [1, 64], strides = [1, 1]} : vector<9x64xf32> to vector<1x64xf32>
    %69 = vector.shape_cast %68 : vector<1x64xf32> to vector<64xf32>
    %70 = vector.shape_cast %69 : vector<64xf32> to vector<1x1x64xf32>
    %71 = vector.broadcast %70 : vector<1x1x64xf32> to vector<16x16x64xf32>
    %72 = arith.mulf %67, %71 : vector<16x16x64xf32>
    %73 = arith.addf %65, %72 : vector<16x16x64xf32>
    %c0_35 = arith.constant 0 : index
    %c0_36 = arith.constant 0 : index
    %74 = vector.load %arg4[%c0_35, %c0_36] : memref<1x64xf32, #tpu.memory_space<vmem>>, vector<1x64xf32>
    %75 = vector.shape_cast %74 : vector<1x64xf32> to vector<1x1x64xf32>
    %76 = vector.broadcast %75 : vector<1x1x64xf32> to vector<16x16x64xf32>
    %77 = arith.addf %73, %76 : vector<16x16x64xf32>
    %78 = vector.shape_cast %77 : vector<16x16x64xf32> to vector<256x64xf32>
    %79 = arith.truncf %78 : vector<256x64xf32> to vector<256x64xbf16>
    %c0_37 = arith.constant 0 : index
    %c0_38 = arith.constant 0 : index
    %80 = vector.load %arg5[%c0_37, %c0_38] : memref<64x128xbf16, #tpu.memory_space<vmem>>, vector<64x128xbf16>
    %cst_39 = arith.constant dense<0.000000e+00> : vector<256x128xf32>
    %81 = tpu.matmul %79, %80, %cst_39 {dimension_numbers = #tpu.dot_dimension_numbers<[1], [0], [0], [1], [0, 0, 1, 1], [], []>} : vector<256x64xbf16>, vector<64x128xbf16>, vector<256x128xf32> -> vector<256x128xf32>
    %c0_40 = arith.constant 0 : index
    %c0_41 = arith.constant 0 : index
    %82 = vector.load %arg6[%c0_40, %c0_41] : memref<1x128xf32, #tpu.memory_space<vmem>>, vector<1x128xf32>
    %83 = vector.broadcast %82 : vector<1x128xf32> to vector<256x128xf32>
    %84 = arith.addf %81, %83 : vector<256x128xf32>
    %c0_42 = arith.constant 0 : index
    %c0_43 = arith.constant 0 : index
    %c0_44 = arith.constant 0 : index
    %85 = vector.load %arg7[%c0_42, %c0_43, %c0_44] : memref<1x256x128xf32, #tpu.memory_space<vmem>>, vector<1x256x128xf32>
    %86 = vector.shape_cast %85 : vector<1x256x128xf32> to vector<256x128xf32>
    %87 = vector.shape_cast %84 : vector<256x128xf32> to vector<1x256x128xf32>
    tpu.vector_store %arg7[%c0_42, %c0_43, %c0_44], %87 {strides = array<i32>} : memref<1x256x128xf32, #tpu.memory_space<vmem>>, vector<1x256x128xf32>,
    return
  }
  func.func @transform_0(%arg0: i32, %arg1: i32) -> (i32, i32, i32, i32) {
    %c0_i32 = arith.constant 0 : i32
    %c0_i32_0 = arith.constant 0 : i32
    %c0_i32_1 = arith.constant 0 : i32
    %c0_i32_2 = arith.constant 0 : i32
    return %arg0, %c0_i32, %c0_i32_0, %c0_i32_1 : i32, i32, i32, i32
  }
  func.func @transform_1(%arg0: i32, %arg1: i32) -> (i32, i32) {
    %c0_i32 = arith.constant 0 : i32
    %c0_i32_0 = arith.constant 0 : i32
    %c0_i32_1 = arith.constant 0 : i32
    return %c0_i32, %c0_i32_0 : i32, i32
  }
  func.func @transform_2(%arg0: i32, %arg1: i32) -> (i32, i32) {
    %c0_i32 = arith.constant 0 : i32
    %c0_i32_0 = arith.constant 0 : i32
    %c0_i32_1 = arith.constant 0 : i32
    return %c0_i32, %c0_i32_0 : i32, i32
  }
  func.func @transform_3(%arg0: i32, %arg1: i32) -> (i32, i32) {
    %c0_i32 = arith.constant 0 : i32
    %c0_i32_0 = arith.constant 0 : i32
    return %c0_i32, %arg1 : i32, i32
  }
  func.func @transform_4(%arg0: i32, %arg1: i32) -> (i32, i32) {
    %c0_i32 = arith.constant 0 : i32
    %c0_i32_0 = arith.constant 0 : i32
    return %c0_i32, %arg1 : i32, i32
  }
  func.func @transform_5(%arg0: i32, %arg1: i32) -> (i32, i32, i32) {
    %c0_i32 = arith.constant 0 : i32
    %c0_i32_0 = arith.constant 0 : i32
    return %arg0, %c0_i32, %arg1 : i32, i32, i32
  }
}

</mosaic_0001>

<bundles_post_ra>
// kernel: depthwise_sep_conv2d.1
= control target key start
LH: loop header
LB: loop body
LE: loop exit
PB: predicated region body
PF: predicated region fallthrough
CT: control target
= control target key end

     0   :  { %10 = vsyncpa [#allocation3], 0  ;;  %s3276_s0 = inlined_call_operand.vmem [shape: f32[2,18,18,64], index: 0, kind: input, shape index: {}]   ;;  %s3277_s1 = inlined_call_operand.vmem [shape: f32[9,64], index: 1, kind: input, shape index: {}]   ;;  %s3278_s2 = inlined_call_operand.vmem [shape: f32[1,64], index: 2, kind: input, shape index: {}]   ;;  %s3279_s3 = inlined_call_operand.vmem [shape: bf16[64,128], index: 3, kind: input, shape index: {}]   ;;  %s3280_s4 = inlined_call_operand.vmem [shape: f32[1,128], index: 4, kind: input, shape index: {}]   ;;  %s3281_s5 = inlined_call_operand.hbm [shape: f32[2,256,128], index: 5, kind: output, shape index: {}]  }
   0x1   :  { %12 = vsyncpa [#allocation3 + $0x1], 0  ;;  %s2098_s18 = smov 0   ;;  %s2100_s19 = smov 0  }
   0x2   :  { %s2102_s20 = smov 0   ;;  %s2104_s21 = smov 0  }
   0x3   :  { %s2106_s22 = smov 0   ;;  %s2108_s23 = smov 0  }
   0x4 LB: > { %s1623_s24 = sadd.s32 4294967295, %s2063_s23   ;;  %s1624_s25 = sadd.s32 4294967294, %s2063_s23   ;;  %s2063_s23 = sphi %s2108_s23, %s18_s23   ;;  %s2059_s22 = sphi %s2106_s22, %s3288_s22   ;;  %s2055_s21 = sphi %s2104_s21, %s3287_s21   ;;  %s2051_s20 = sphi %s2102_s20, %s3286_s20   ;;  %s2047_s19 = sphi %s2100_s19, %s3285_s19   ;;  %s2043_s18 = sphi %s2098_s18, %s3284_s18  }
   0x5   : > { %s30_s26 = sadd.s32 1, %s2059_s22  ;;  %s159_s27 = sadd.s32 1, %s2051_s20 }
   0x6   : > { %p32_p0 = scmp.ge.s32.totalorder %s30_s26, 2  ;;  %p169_p1 = scmp.ne.s32.totalorder %s2051_s20, %s2047_s19 }
   0x7   : > { %p170_p2 = scmp.eq.s32.totalorder %s1623_s24, 1  ;;  %p175_p3 = scmp.ne.s32.totalorder %s2047_s19, %s2043_s18 }
   0x8   : > { %s3290_s26 = smov (%p32_p0, %s30_s26), 0  ;;  %p176_p5 = scmp.eq.s32.totalorder %s1624_s25, 1 }
   0x9   : > { %p2138_p4 = por %p170_p2, %p169_p1  ;;  %s154_s29 = ssub.s32 %s2059_s22, %s3290_s26 }
   0xa   : > { %p1629_p6 = scmp.ge.s32.totalorder %s2063_s23, 1  ;;  %p157_p7 = scmp.eq.s32.totalorder %s154_s29, 0 }
   0xb   : > { %p2145_p8 = por %p176_p5, %p175_p3  ;;  %p221_p9 = scmp.lt.s32.totalorder %s2063_s23, 3 }
   0xc   : > { %s2151_s6 = scalar_select %p157_p7, %s2051_s20, %s159_s27  }
   0xd   : > { %p222_p10 = pnand %p1629_p6, %p221_p9 }
   0xe   : > { %v1979_v0 = vld [vmem:[%s3279_s3] sm:$0xff] (!%p222_p10)   ;;  %p256_p11 = scmp.lt.s32.totalorder (!%p222_p10), %s2055_s21, 1  ;;  %v303_v1 = vlaneseq (!%p222_p10)  ;;  %v1980_v2 = vld [vmem:[%s3279_s3 + $0x8] sm:$0xff] (!%p222_p10)   ;;  %v1981_v4 = vld [vmem:[%s3279_s3 + $0x10] sm:$0xff] (!%p222_p10)   ;;  %vm1267_vm0 = vcmask (!%p222_p10), 523264   ;;  %s253_s15 = sand.u32 (!%p222_p10), 1, %s2047_s19  }
   0xf   : > { %225 = sbr.rel (%p222_p10) target bundleno = 419 (0x1a3), region = 40  ;;  %1873 = vmatprep.subr.bf16.mxu0 (!%p222_p10), %v1979_v0  ;;  %1913 = vmatprep.subr.bf16.mxu1 (!%p222_p10), %v1979_v0  ;;  %v269_v5 = vld [vmem:[%s3277_s1] sm:$0xff] (!%p222_p10)  ;;  %v2176_v10 = vld [vmem:[%s3279_s3 + $0x18] sm:$0xff] (!%p222_p10)   ;;  %v2218_v33 = vld [vmem:[%s3277_s1 + $0x8] ss:$0 sm:$0xff] (!%p222_p10)  ;;  %s1630_s16 = sshll.u32 (!%p222_p10), %s253_s15, 8 }
  0x10   : > { %1874 = vmatpush3.bf16.msra.mxu0 (!%p222_p10), %v1979_v0  ;;  %1917 = vmatpush3.bf16.msra.mxu1 (!%p222_p10), %v1979_v0  ;;  %v2161_v3 = vshrl.u32 (!%p222_p10), %v303_v1, 7  ;;  %s3155_s25 = scalar_lea.vmem (!%p222_p10), [#allocation2], %s1630_s16  ;;  %s1852_s27 = sshll.u32 (!%p222_p10), %s2055_s21, 12 }
  0x11   : > { %1875 = vmatprep.subr.bf16.mxu0 (!%p222_p10), %v1980_v2  ;;  %1914 = vmatprep.subr.bf16.mxu1 (!%p222_p10), %v1980_v2  ;;  %s3220_s9 = scalar_lea.hbm (!%p222_p10), %s3281_s5, %s1852_s27 }
  0x12   : > { %v305_v6 = vsub.s32 (!%p222_p10), 0, %v2161_v3  ;;  %v405_v7 = vsub.s32 (!%p222_p10), 1, %v2161_v3  ;;  %v505_v8 = vsub.s32 (!%p222_p10), 2, %v2161_v3  ;;  %v606_v9 = vsub.s32 (!%p222_p10), 3, %v2161_v3 }
  0x13   : > { %v706_v11 = vsub.s32 (!%p222_p10), 4, %v2161_v3  ;;  %v806_v12 = vsub.s32 (!%p222_p10), 5, %v2161_v3  ;;  %v907_v19 = vsub.s32 (!%p222_p10), 6, %v2161_v3  ;;  %v1007_v26 = vsub.s32 (!%p222_p10), 7, %v2161_v3 }
  0x14   : > { %1876 = vmatpush3.bf16.msra.mxu0 (!%p222_p10), %v1980_v2  ;;  %1918 = vmatpush3.bf16.msra.mxu1 (!%p222_p10), %v1980_v2  ;;  %v2187_v15 = vrot.slane (!%p222_p10), %v269_v5, %v305_v6  ;;  %v2190_v17 = vrot.slane (!%p222_p10), %v269_v5, %v405_v7  ;;  %v2192_v18 = vrot.slane (!%p222_p10), %v269_v5, %v505_v8 }
  0x15   : > { %1877 = vmatprep.subr.bf16.mxu0 (!%p222_p10), %v1981_v4  ;;  %1915 = vmatprep.subr.bf16.mxu1 (!%p222_p10), %v1981_v4  ;;  %v2198_v23 = vrot.slane (!%p222_p10), %v269_v5, %v606_v9  ;;  %v2200_v24 = vrot.slane (!%p222_p10), %v269_v5, %v706_v11  ;;  %v2202_v25 = vrot.slane (!%p222_p10), %v269_v5, %v806_v12 }
  0x16   : > { %s257_s11 = scalar_select %p256_p11, %s2055_s21, 1  ;;  %v2257_v53 = vrot.slane %v269_v5, %v907_v19  ;;  %v2259_v54 = vrot.slane %v269_v5, %v1007_v26 }
  0x17   : > { %s3230_s21 = scalar_lea.sflag [#allocation3], %s253_s15 }
  0x18   : > { %s1921_s14 = smul.u32 432, %s257_s11  ;;  %1878 = vmatpush3.bf16.msra.mxu0 %v1981_v4  ;;  %1919 = vmatpush3.bf16.msra.mxu1 %v1981_v4  ;;  %s2065_s11 = smov [#allocation2]  }
  0x19   : > { %1879 = vmatprep.subr.bf16.mxu0 %v2176_v10  ;;  %1916 = vmatprep.subr.bf16.mxu1 %v2176_v10  ;;  %s1989_s12 = sshll.u32 %s2065_s11, 4  ;;  %s1990_s12 = int_to_ptr.vmem [resolvable:$false] %s1989_s12 }
  0x1a   : > { %s2181_s29 = scalar_lea.vmem %s3276_s0, %s1921_s14  ;;  %s1991_s13 = scalar_lea.vmem %s1990_s12, 8192 }
  0x1b   : > { %v271_v13 = vld [vmem:[%s2181_s29] sm:$0xff]  ;;  %v272_v14 = vld [vmem:[%s2181_s29 + $0x8] sm:$0xff]  ;;  %v2210_v31 = vld [vmem:[%s2181_s29 + $0x18] sm:$0xff] }
  0x1c   : > { %v371_v16 = vld [vmem:[%s2181_s29 + $0x1] sm:$0xff]  ;;  %v372_v20 = vld [vmem:[%s2181_s29 + $0x9] sm:$0xff]  ;;  %v307_v27 = vmul.f32 %v2187_v15, %v271_v13  ;;  %v308_v28 = vmul.f32 %v2187_v15, %v272_v14  ;;  %v608_v36 = vmul.f32 %v2210_v31, %v2198_v23  ;;  %v2227_v38 = vld [vmem:[%s2181_s29 + $0x19] sm:$0xff]  ;;  %1880 = vmatpush3.bf16.msra.mxu0 %v2176_v10  ;;  %1920 = vmatpush3.bf16.msra.mxu1 %v2176_v10 }
  0x1d   : > { %v471_v21 = vld [vmem:[%s2181_s29 + $0x2] sm:$0xff]  ;;  %v472_v22 = vld [vmem:[%s2181_s29 + $0xa] sm:$0xff]  ;;  %v407_v29 = vmul.f32 %v2190_v17, %v371_v16  ;;  %v408_v30 = vmul.f32 %v2190_v17, %v372_v20  ;;  %v708_v42 = vmul.f32 %v2227_v38, %v2200_v24  ;;  %v2235_v43 = vld [vmem:[%s2181_s29 + $0x1a] sm:$0xff] }
  0x1e   : > { %v2213_v32 = vld [vmem:[%s2181_s29 + $0x20] sm:$0xff]  ;;  %v507_v34 = vmul.f32 %v2192_v18, %v471_v21  ;;  %v508_v35 = vmul.f32 %v2192_v18, %v472_v22  ;;  %v808_v46 = vmul.f32 %v2235_v43, %v2202_v25  ;;  %v2249_v48 = vld [vmem:[%s2181_s29 + $0x30] sm:$0xff]  ;;  %v288_v56 = vld [vmem:[%s2181_s29 + $0xc8] sm:$0xff] }
  0x1f   : > { %v609_v37 = vmul.f32 %v2213_v32, %v2198_v23  ;;  %v439_v39 = vadd.f32 %v407_v29, %v307_v27  ;;  %v440_v40 = vadd.f32 %v408_v30, %v308_v28  ;;  %v2230_v41 = vld [vmem:[%s2181_s29 + $0x21] sm:$0xff]  ;;  %v2252_v49 = vld [vmem:[%s2181_s29 + $0x32] sm:$0xff]  ;;  %v324_v62 = vmul.f32 %v2187_v15, %v288_v56  ;;  %v388_v63 = vld [vmem:[%s2181_s29 + $0xc9] sm:$0xff] }
  0x20   : > { %v2238_v44 = vld [vmem:[%s2181_s29 + $0x22] sm:$0xff]  ;;  %v709_v45 = vmul.f32 %v2230_v41, %v2200_v24  ;;  %v2255_v50 = vld [vmem:[%s2181_s29 + $0x3a] sm:$0xff]  ;;  %v2269_v59 = vmul.f32 %v2218_v33, %v2252_v49  ;;  %v909_v3 = vmul.f32 %v2249_v48, %v2257_v53  ;;  %v2284_v4 = vld [vmem:[%s2181_s29 + $0x31] sm:$0xff]  ;;  %v424_v13 = vmul.f32 %v2190_v17, %v388_v63 }
  0x21   : > { %v809_v47 = vmul.f32 %v2238_v44, %v2202_v25  ;;  %v539_v51 = vadd.f32 %v507_v34, %v439_v39  ;;  %v540_v52 = vadd.f32 %v508_v35, %v440_v40  ;;  %v287_v55 = vld [vmem:[%s2181_s29 + $0xc0] sm:$0xff]  ;;  %v2265_v58 = vld [vmem:[%s2181_s29 + $0x38] sm:$0xff]  ;;  %v2273_v60 = vmul.f32 %v2218_v33, %v2255_v50  ;;  %v488_v6 = vld [vmem:[%s2181_s29 + $0xca] sm:$0xff] }
  0x22   : > { %v387_v57 = vld [vmem:[%s2181_s29 + $0xc1] sm:$0xff]  ;;  %v323_v61 = vmul.f32 %v2187_v15, %v287_v55  ;;  %v2287_v5 = vld [vmem:[%s2181_s29 + $0x39] sm:$0xff]  ;;  %v910_v7 = vmul.f32 %v2265_v58, %v2257_v53  ;;  %v1009_v8 = vmul.f32 %v2284_v4, %v2259_v54  ;;  %v524_v21 = vmul.f32 %v2192_v18, %v488_v6 }
  0x23   : > { %v487_v0 = vld [vmem:[%s2181_s29 + $0xc2] sm:$0xff]  ;;  %v640_v1 = vadd.f32 %v608_v36, %v539_v51  ;;  %v641_v2 = vadd.f32 %v609_v37, %v540_v52  ;;  %v1010_v9 = vmul.f32 %v2287_v5, %v2259_v54  ;;  %v423_v10 = vmul.f32 %v2190_v17, %v387_v57  ;;  %v2300_v16 = vld [vmem:[%s2181_s29 + $0xd8] sm:$0xff] }
  0x24   : > { %v523_v14 = vmul.f32 %v2192_v18, %v487_v0  ;;  %v2303_v19 = vld [vmem:[%s2181_s29 + $0xe0] sm:$0xff]  ;;  %v624_v22 = vmul.f32 %v2300_v16, %v2198_v23  ;;  %v456_v30 = vadd.f32 %v424_v13, %v324_v62  ;;  %v2334_v55 = vld [vmem:[%s2181_s29 + $0xf8] sm:$0xff] }
  0x25   : > { %v740_v11 = vadd.f32 %v708_v42, %v640_v1  ;;  %v741_v12 = vadd.f32 %v709_v45, %v641_v2  ;;  %v455_v20 = vadd.f32 %v423_v10, %v323_v61  ;;  %v625_v26 = vmul.f32 %v2303_v19, %v2198_v23  ;;  %v2311_v27 = vld [vmem:[%s2181_s29 + $0xd9] sm:$0xff]  ;;  %v2314_v34 = vld [vmem:[%s2181_s29 + $0xe1] sm:$0xff]  ;;  %v2339_v57 = vld [vmem:[%s2181_s29 + $0xf1] sm:$0xff] }
  0x26   : > { %v724_v35 = vmul.f32 %v2311_v27, %v2200_v24  ;;  %v2319_v36 = vld [vmem:[%s2181_s29 + $0xda] sm:$0xff]  ;;  %v2322_v37 = vld [vmem:[%s2181_s29 + $0xe2] sm:$0xff]  ;;  %v725_v40 = vmul.f32 %v2314_v34, %v2200_v24  ;;  %v556_v52 = vadd.f32 %v524_v21, %v456_v30  ;;  %v926_v63 = vmul.f32 %v2334_v55, %v2257_v53  ;;  %v2351_v2 = vld [vmem:[%s2181_s29 + $0xf2] sm:$0xff] }
  0x27   : > { %v840_v28 = vadd.f32 %v808_v46, %v740_v11  ;;  %v841_v29 = vadd.f32 %v809_v47, %v741_v12  ;;  %v555_v39 = vadd.f32 %v523_v14, %v455_v20  ;;  %v824_v42 = vmul.f32 %v2319_v36, %v2202_v25  ;;  %v2331_v46 = vld [vmem:[%s2181_s29 + $0xf0] sm:$0xff]  ;;  %v2342_v61 = vld [vmem:[%s2181_s29 + $0xf9] sm:$0xff] }
  0x28   : > { %v825_v45 = vmul.f32 %v2322_v37, %v2202_v25  ;;  %v925_v56 = vmul.f32 %v2331_v46, %v2257_v53  ;;  %v1025_v0 = vmul.f32 %v2339_v57, %v2259_v54  ;;  %v1026_v1 = vmul.f32 %v2342_v61, %v2259_v54  ;;  %v2354_v10 = vld [vmem:[%s2181_s29 + $0xfa] sm:$0xff] }
  0x29   : > { %v941_v47 = vadd.f32 %v909_v3, %v840_v28  ;;  %v942_v51 = vadd.f32 %v910_v7, %v841_v29  ;;  %v656_v62 = vadd.f32 %v624_v22, %v555_v39  ;;  %v657_v7 = vadd.f32 %v625_v26, %v556_v52  ;;  %v2361_v12 = vld [vmem:[%s3278_s2] ss:$0 sm:$0xff] }
  0x2a   : > { %v1125_v11 = vmul.f32 %v2218_v33, %v2351_v2  ;;  %v1126_v14 = vmul.f32 %v2218_v33, %v2354_v10  ;;  %v309_v20 = vmul.f32 %v2210_v31, %v2187_v15  ;;  %v409_v26 = vmul.f32 %v2227_v38, %v2190_v17 }
  0x2b   : > { %v1041_v3 = vadd.f32 %v1009_v8, %v941_v47  ;;  %v1042_v6 = vadd.f32 %v1010_v9, %v942_v51  ;;  %v756_v13 = vadd.f32 %v724_v35, %v656_v62  ;;  %v310_v8 = vmul.f32 %v2213_v32, %v2187_v15  ;;  %v2392_v62 = vld [vmem:[%s2181_s29 + $0x48] sm:$0xff] }
  0x2c   : > { %v757_v22 = vadd.f32 %v725_v40, %v657_v7  ;;  %v410_v29 = vmul.f32 %v2230_v41, %v2190_v17  ;;  %v509_v30 = vmul.f32 %v2235_v43, %v2192_v18  ;;  %v510_v31 = vmul.f32 %v2238_v44, %v2192_v18  ;;  %v2398_v7 = vld [vmem:[%s2181_s29 + $0x50] sm:$0xff] }
  0x2d   : > { %v1141_v9 = vadd.f32 %v2269_v59, %v1041_v3  ;;  %v1142_v21 = vadd.f32 %v2273_v60, %v1042_v6  ;;  %v856_v28 = vadd.f32 %v824_v42, %v756_v13  ;;  %v441_v35 = vadd.f32 %v409_v26, %v309_v20  ;;  %v2403_v13 = vld [vmem:[%s2181_s29 + $0x49] sm:$0xff] }
  0x2e   : > { %v857_v60 = vadd.f32 %v825_v45, %v757_v22  ;;  %v442_v40 = vadd.f32 %v410_v29, %v310_v8  ;;  %v610_v38 = vmul.f32 %v2249_v48, %v2198_v23  ;;  %v611_v41 = vmul.f32 %v2265_v58, %v2198_v23  ;;  %v2413_v22 = vld [vmem:[%s2181_s29 + $0x4a] sm:$0xff] }
  0x2f   : > { %v1180_v32 = vadd.f32 %v2361_v12, %v1141_v9  ;;  %v1181_v59 = vadd.f32 %v2361_v12, %v1142_v21  ;;  %v957_v39 = vadd.f32 %v925_v56, %v856_v28  ;;  %v541_v44 = vadd.f32 %v509_v30, %v441_v35  ;;  %v2408_v21 = vld [vmem:[%s2181_s29 + $0x51] sm:$0xff] }
  0x30   : > { %v958_v42 = vadd.f32 %v926_v63, %v857_v60  ;;  %v710_v47 = vmul.f32 %v2284_v4, %v2200_v24  ;;  %v542_v45 = vadd.f32 %v510_v31, %v442_v40  ;;  %v711_v52 = vmul.f32 %v2287_v5, %v2200_v24  ;;  %v2418_v30 = vld [vmem:[%s2181_s29 + $0x52] sm:$0xff] }
  0x31   : > { %v1212_v43 = vpack.c.bf16 %v1181_v59, %v1180_v32  ;;  %v1057_v51 = vadd.f32 %v1025_v0, %v957_v39  ;;  %v810_v56 = vmul.f32 %v2252_v49, %v2202_v25  ;;  %v642_v3 = vadd.f32 %v610_v38, %v541_v44 }
  0x32   : > { %v1058_v63 = vadd.f32 %v1026_v1, %v958_v42  ;;  %v811_v6 = vmul.f32 %v2255_v50, %v2202_v25  ;;  %v911_v0 = vmul.f32 %v2392_v62, %v2257_v53  ;;  %v643_v8 = vadd.f32 %v611_v41, %v542_v45 }
  0x33   : > { %1881 = vmatprep.mubr.msk.bf16.mxu0 %vm1267_vm0, %v1212_v43  ;;  %v1157_v20 = vadd.f32 %v1125_v11, %v1057_v51  ;;  %v912_v9 = vmul.f32 %v2398_v7, %v2257_v53  ;;  %v1011_v1 = vmul.f32 %v2403_v13, %v2259_v54  ;;  %v742_v28 = vadd.f32 %v710_v47, %v642_v3 }
  0x34   : > { %v1158_v26 = vadd.f32 %v1126_v14, %v1058_v63  ;;  %v1012_v29 = vmul.f32 %v2408_v21, %v2259_v54  ;;  %v1111_v11 = vmul.f32 %v2218_v33, %v2413_v22  ;;  %v743_v32 = vadd.f32 %v711_v52, %v643_v8  ;;  %v2450_v63 = vld [vmem:[%s2181_s29 + $0x108] sm:$0xff] }
  0x35   : > { %v1196_v31 = vadd.f32 %v2361_v12, %v1157_v20  ;;  %v1112_v59 = vmul.f32 %v2218_v33, %v2418_v30  ;;  %v325_v60 = vmul.f32 %v2300_v16, %v2187_v15  ;;  %v842_v35 = vadd.f32 %v810_v56, %v742_v28  ;;  %v2455_v20 = vld [vmem:[%s2181_s29 + $0x110] sm:$0xff] }
  0x36   : > { %v1197_v14 = vadd.f32 %v2361_v12, %v1158_v26  ;;  %v326_v39 = vmul.f32 %v2303_v19, %v2187_v15  ;;  %v425_v40 = vmul.f32 %v2311_v27, %v2190_v17  ;;  %v843_v38 = vadd.f32 %v811_v6, %v743_v32  ;;  %v2470_v32 = vld [vmem:[%s2181_s29 + $0x10a] sm:$0xff] }
  0x37   : > { %v426_v41 = vmul.f32 %v2314_v34, %v2190_v17  ;;  %v525_v43 = vmul.f32 %v2319_v36, %v2192_v18  ;;  %v526_v16 = vmul.f32 %v2322_v37, %v2192_v18  ;;  %v943_v44 = vadd.f32 %v911_v0, %v842_v35 }
  0x38   : > { %v1220_v42 = vpack.c.bf16 %v1197_v14, %v1196_v31  ;;  %v457_v47 = vadd.f32 %v425_v40, %v325_v60  ;;  %v626_v19 = vmul.f32 %v2331_v46, %v2198_v23  ;;  %v944_v27 = vadd.f32 %v912_v9, %v843_v38  ;;  %v2460_v9 = vld [vmem:[%s2181_s29 + $0x109] sm:$0xff]  ;;  %v2465_v31 = vld [vmem:[%s2181_s29 + $0x111] sm:$0xff] }
  0x39   : > { %v458_v51 = vadd.f32 %v426_v41, %v326_v39  ;;  %v627_v34 = vmul.f32 %v2334_v55, %v2198_v23  ;;  %v726_v45 = vmul.f32 %v2339_v57, %v2200_v24  ;;  %v1043_v36 = vadd.f32 %v1011_v1, %v943_v44  ;;  %v2475_v39 = vld [vmem:[%s2181_s29 + $0x112] sm:$0xff] }
  0x3a   : > { %1897 = vmatprep.mubr.msk.bf16.mxu1 %vm1267_vm0, %v1220_v42  ;;  %v557_v37 = vadd.f32 %v525_v43, %v457_v47  ;;  %v727_v52 = vmul.f32 %v2342_v61, %v2200_v24  ;;  %v826_v56 = vmul.f32 %v2351_v2, %v2202_v25  ;;  %v1044_v3 = vadd.f32 %v1012_v29, %v944_v27 }
  0x3b   : > { %v558_v6 = vadd.f32 %v526_v16, %v458_v51  ;;  %v827_v0 = vmul.f32 %v2354_v10, %v2202_v25  ;;  %v927_v8 = vmul.f32 %v2450_v63, %v2257_v53  ;;  %v1143_v1 = vadd.f32 %v1111_v11, %v1043_v36 }
  0x3c   : > { %v658_v26 = vadd.f32 %v626_v19, %v557_v37  ;;  %v928_v28 = vmul.f32 %v2455_v20, %v2257_v53  ;;  %v1027_v29 = vmul.f32 %v2460_v9, %v2259_v54  ;;  %v1144_v60 = vadd.f32 %v1112_v59, %v1044_v3  ;;  %v2507_v3 = vld [vmem:[%s2181_s29 + $0x60] sm:$0xff] }
  0x3d   : > { %v659_v14 = vadd.f32 %v627_v34, %v558_v6  ;;  %v1028_v35 = vmul.f32 %v2465_v31, %v2259_v54  ;;  %v1127_v11 = vmul.f32 %v2218_v33, %v2470_v32  ;;  %v1182_v40 = vadd.f32 %v2361_v12, %v1143_v1  ;;  %v2512_v1 = vld [vmem:[%s2181_s29 + $0x68] sm:$0xff] }
  0x3e   : > { %v758_v38 = vadd.f32 %v726_v45, %v658_v26  ;;  %v1128_v41 = vmul.f32 %v2218_v33, %v2475_v39  ;;  %v311_v43 = vmul.f32 %v2249_v48, %v2187_v15  ;;  %v1183_v59 = vadd.f32 %v2361_v12, %v1144_v60 }
  0x3f   : > { %v759_v16 = vadd.f32 %v727_v52, %v659_v14  ;;  %v312_v42 = vmul.f32 %v2265_v58, %v2187_v15  ;;  %v411_v44 = vmul.f32 %v2284_v4, %v2190_v17  ;;  %v412_v19 = vmul.f32 %v2287_v5, %v2190_v17 }
  0x40   : > { %v858_v47 = vadd.f32 %v826_v56, %v758_v38  ;;  %v511_v27 = vmul.f32 %v2252_v49, %v2192_v18  ;;  %v512_v48 = vmul.f32 %v2255_v50, %v2192_v18  ;;  %v1213_v51 = vpack.c.bf16 %v1183_v59, %v1182_v40  ;;  %v2522_v38 = vld [vmem:[%s2181_s29 + $0x69] sm:$0xff] }
  0x41   : > { %v859_v34 = vadd.f32 %v827_v0, %v759_v16  ;;  %v443_v45 = vadd.f32 %v411_v44, %v311_v43  ;;  %v612_v58 = vmul.f32 %v2392_v62, %v2198_v23  ;;  %v444_v36 = vadd.f32 %v412_v19, %v312_v42  ;;  %v2527_v43 = vld [vmem:[%s2181_s29 + $0x62] sm:$0xff]  ;;  %v2532_v44 = vld [vmem:[%s2181_s29 + $0x6a] sm:$0xff] }
  0x42   : > { %v959_v4 = vadd.f32 %v927_v8, %v858_v47  ;;  %v613_v5 = vmul.f32 %v2398_v7, %v2198_v23  ;;  %v712_v37 = vmul.f32 %v2403_v13, %v2200_v24  ;;  %1882 = vmatmul.mubr.msk.bf16.vlgmr.msra.gmra.mrb[0].mxu0 %vm1267_vm0, %v1213_v51  ;;  %v713_v52 = vmul.f32 %v2408_v21, %v2200_v24 }
  0x43   : > { %v960_v49 = vadd.f32 %v928_v28, %v859_v34  ;;  %v543_v50 = vadd.f32 %v511_v27, %v443_v45  ;;  %v812_v56 = vmul.f32 %v2413_v22, %v2202_v25  ;;  %v544_v0 = vadd.f32 %v512_v48, %v444_v36  ;;  %v2517_v28 = vld [vmem:[%s2181_s29 + $0x61] sm:$0xff] }
  0x44   : > { %v1059_v6 = vadd.f32 %v1027_v29, %v959_v4  ;;  %v813_v8 = vmul.f32 %v2418_v30, %v2202_v25  ;;  %v913_v26 = vmul.f32 %v2507_v3, %v2257_v53  ;;  %v914_v40 = vmul.f32 %v2512_v1, %v2257_v53 }
  0x45   : > { %v1060_v60 = vadd.f32 %v1028_v35, %v960_v49  ;;  %v644_v14 = vadd.f32 %v612_v58, %v543_v50  ;;  %v1013_v29 = vmul.f32 %v2517_v28, %v2259_v54  ;;  %v645_v16 = vadd.f32 %v613_v5, %v544_v0 }
  0x46   : > { %v1159_v59 = vadd.f32 %v1127_v11, %v1059_v6  ;;  %v1014_v42 = vmul.f32 %v2522_v38, %v2259_v54  ;;  %v1113_v35 = vmul.f32 %v2218_v33, %v2527_v43  ;;  %v1114_v27 = vmul.f32 %v2218_v33, %v2532_v44 }
  0x47   : > { %v1160_v47 = vadd.f32 %v1128_v41, %v1060_v60  ;;  %v744_v19 = vadd.f32 %v712_v37, %v644_v14  ;;  %v327_v48 = vmul.f32 %v2331_v46, %v2187_v15  ;;  %v745_v11 = vadd.f32 %v713_v52, %v645_v16  ;;  %v2566_v60 = vld [vmem:[%s2181_s29 + $0x120] sm:$0xff]  ;;  %v2569_v14 = vld [vmem:[%s2181_s29 + $0x128] sm:$0xff] }
  0x48   : > { %v1198_v51 = vadd.f32 %v2361_v12, %v1159_v59  ;;  %v328_v34 = vmul.f32 %v2334_v55, %v2187_v15  ;;  %v427_v45 = vmul.f32 %v2339_v57, %v2190_v17  ;;  %v428_v41 = vmul.f32 %v2342_v61, %v2190_v17 }
  0x49   : > { %v1199_v58 = vadd.f32 %v2361_v12, %v1160_v47  ;;  %v844_v4 = vadd.f32 %v812_v56, %v744_v19  ;;  %v527_v36 = vmul.f32 %v2351_v2, %v2192_v18  ;;  %v845_v5 = vadd.f32 %v813_v8, %v745_v11  ;;  %v2576_v47 = vld [vmem:[%s2181_s29 + $0x121] sm:$0xff]  ;;  %v2579_v19 = vld [vmem:[%s2181_s29 + $0x129] sm:$0xff] }
  0x4a   : > { %v459_v46 = vadd.f32 %v427_v45, %v327_v48  ;;  %v528_v37 = vmul.f32 %v2354_v10, %v2192_v18  ;;  %v628_v55 = vmul.f32 %v2450_v63, %v2198_v23  ;;  %v460_v50 = vadd.f32 %v428_v41, %v328_v34  ;;  %v2589_v45 = vld [vmem:[%s2181_s29 + $0x12a] sm:$0xff] }
  0x4b   : > { %v1221_v57 = vpack.c.bf16 %v1199_v58, %v1198_v51  ;;  %v945_v49 = vadd.f32 %v913_v26, %v844_v4  ;;  %v629_v52 = vmul.f32 %v2455_v20, %v2198_v23  ;;  %v946_v61 = vadd.f32 %v914_v40, %v845_v5 }
  0x4c   : > { %v559_v2 = vadd.f32 %v527_v36, %v459_v46  ;;  %v728_v56 = vmul.f32 %v2460_v9, %v2200_v24  ;;  %v729_v10 = vmul.f32 %v2465_v31, %v2200_v24  ;;  %v560_v0 = vadd.f32 %v528_v37, %v460_v50 }
  0x4d   : > { %1898 = vmatmul.mubr.msk.bf16.vlgmr.msra.gmra.mrb[0].mxu1 %vm1267_vm0, %v1221_v57  ;;  %v1045_v6 = vadd.f32 %v1013_v29, %v945_v49  ;;  %v828_v8 = vmul.f32 %v2470_v32, %v2202_v25  ;;  %v829_v26 = vmul.f32 %v2475_v39, %v2202_v25  ;;  %v1046_v40 = vadd.f32 %v1014_v42, %v946_v61  ;;  %v2586_v42 = vld [vmem:[%s2181_s29 + $0x122] sm:$0xff] }
  0x4e   : > { %v660_v59 = vadd.f32 %v628_v55, %v559_v2  ;;  %v929_v16 = vmul.f32 %v2566_v60, %v2257_v53  ;;  %v930_v29 = vmul.f32 %v2569_v14, %v2257_v53  ;;  %v661_v51 = vadd.f32 %v629_v52, %v560_v0 }
  0x4f   : > { %v1145_v48 = vadd.f32 %v1113_v35, %v1045_v6  ;;  %v1029_v11 = vmul.f32 %v2576_v47, %v2259_v54  ;;  %v1030_v34 = vmul.f32 %v2579_v19, %v2259_v54  ;;  %v1146_v58 = vadd.f32 %v1114_v27, %v1046_v40  ;;  %v2621_v40 = vld [vmem:[%s2181_s29 + $0x78] sm:$0xff] }
  0x50   : > { %v760_v4 = vadd.f32 %v728_v56, %v660_v59  ;;  %v1129_v41 = vmul.f32 %v2218_v33, %v2586_v42  ;;  %v1130_v36 = vmul.f32 %v2218_v33, %v2589_v45  ;;  %v761_v5 = vadd.f32 %v729_v10, %v661_v51  ;;  %v2624_v59 = vld [vmem:[%s2181_s29 + $0x80] sm:$0xff] }
  0x51   : > { %v1184_v35 = vadd.f32 %v2361_v12, %v1145_v48  ;;  %v313_v46 = vmul.f32 %v2392_v62, %v2187_v15  ;;  %v314_v37 = vmul.f32 %v2398_v7, %v2187_v15  ;;  %v1185_v55 = vadd.f32 %v2361_v12, %v1146_v58 }
  0x52   : > { %v860_v57 = vadd.f32 %v828_v8, %v760_v4  ;;  %v413_v27 = vmul.f32 %v2403_v13, %v2190_v17  ;;  %v414_v49 = vmul.f32 %v2408_v21, %v2190_v17  ;;  %v861_v50 = vadd.f32 %v829_v26, %v761_v5  ;;  %v2636_v5 = vld [vmem:[%s2181_s29 + $0x81] sm:$0xff] }
  0x53   : > { %v513_v52 = vmul.f32 %v2413_v22, %v2192_v18  ;;  %v514_v62 = vmul.f32 %v2418_v30, %v2192_v18  ;;  %v614_v7 = vmul.f32 %v2507_v3, %v2198_v23  ;;  %v1214_v61 = vpack.c.bf16 %v1185_v55, %v1184_v35 }
  0x54   : > { %v961_v2 = vadd.f32 %v929_v16, %v860_v57  ;;  %v445_v56 = vadd.f32 %v413_v27, %v313_v46  ;;  %v446_v10 = vadd.f32 %v414_v49, %v314_v37  ;;  %v962_v13 = vadd.f32 %v930_v29, %v861_v50  ;;  %v2644_v37 = vld [vmem:[%s2181_s29 + $0x82] sm:$0xff] }
  0x55   : > { %v615_v21 = vmul.f32 %v2512_v1, %v2198_v23  ;;  %v714_v22 = vmul.f32 %v2517_v28, %v2200_v24  ;;  %v715_v6 = vmul.f32 %v2522_v38, %v2200_v24  ;;  %1885 = vmatprep.mubr.msk.bf16.mxu0 %vm1267_vm0, %v1214_v61  ;;  %v814_v26 = vmul.f32 %v2527_v43, %v2202_v25 }
  0x56   : > { %v1061_v30 = vadd.f32 %v1029_v11, %v961_v2  ;;  %v545_v0 = vadd.f32 %v513_v52, %v445_v56  ;;  %v546_v8 = vadd.f32 %v514_v62, %v446_v10  ;;  %v1062_v16 = vadd.f32 %v1030_v34, %v962_v13  ;;  %v2633_v11 = vld [vmem:[%s2181_s29 + $0x79] sm:$0xff] }
  0x57   : > { %v815_v29 = vmul.f32 %v2532_v44, %v2202_v25  ;;  %v915_v48 = vmul.f32 %v2621_v40, %v2257_v53  ;;  %v916_v51 = vmul.f32 %v2624_v59, %v2257_v53  ;;  %v1015_v46 = vmul.f32 %v2633_v11, %v2259_v54  ;;  %v2641_v34 = vld [vmem:[%s2181_s29 + $0x7a] sm:$0xff] }
  0x58   : > { %v1161_v58 = vadd.f32 %v1129_v41, %v1061_v30  ;;  %v646_v4 = vadd.f32 %v614_v7, %v545_v0  ;;  %v647_v35 = vadd.f32 %v615_v21, %v546_v8  ;;  %v1162_v55 = vadd.f32 %v1130_v36, %v1062_v16  ;;  %v2678_v16 = vld [vmem:[%s2181_s29 + $0x138] sm:$0xff] }
  0x59   : > { %v1016_v57 = vmul.f32 %v2636_v5, %v2259_v54  ;;  %v1115_v27 = vmul.f32 %v2218_v33, %v2641_v34  ;;  %v1116_v41 = vmul.f32 %v2218_v33, %v2644_v37  ;;  %v329_v62 = vmul.f32 %v2450_v63, %v2187_v15 }
  0x5a   : > { %v1200_v49 = vadd.f32 %v2361_v12, %v1161_v58  ;;  %v746_v50 = vadd.f32 %v714_v22, %v646_v4  ;;  %v747_v52 = vadd.f32 %v715_v6, %v647_v35  ;;  %v1201_v7 = vadd.f32 %v2361_v12, %v1162_v55  ;;  %v2683_v58 = vld [vmem:[%s2181_s29 + $0x140] sm:$0xff] }
  0x5b   : > { %v330_v36 = vmul.f32 %v2455_v20, %v2187_v15  ;;  %v429_v61 = vmul.f32 %v2460_v9, %v2190_v17  ;;  %v430_v2 = vmul.f32 %v2465_v31, %v2190_v17  ;;  %v529_v13 = vmul.f32 %v2470_v32, %v2192_v18  ;;  %v2688_v35 = vld [vmem:[%s2181_s29 + $0x139] sm:$0xff] }
  0x5c   : > { %v846_v56 = vadd.f32 %v814_v26, %v746_v50  ;;  %v847_v10 = vadd.f32 %v815_v29, %v747_v52  ;;  %v530_v63 = vmul.f32 %v2475_v39, %v2192_v18  ;;  %v1222_v21 = vpack.c.bf16 %v1201_v7, %v1200_v49  ;;  %v2693_v52 = vld [vmem:[%s2181_s29 + $0x141] sm:$0xff] }
  0x5d   : > { %v461_v22 = vadd.f32 %v429_v61, %v329_v62  ;;  %v462_v6 = vadd.f32 %v430_v2, %v330_v36  ;;  %v630_v20 = vmul.f32 %v2566_v60, %v2198_v23  ;;  %v631_v31 = vmul.f32 %v2569_v14, %v2198_v23  ;;  %v2703_v61 = vld [vmem:[%s2181_s29 + $0x142] sm:$0xff] }
  0x5e   : > { %v947_v9 = vadd.f32 %v915_v48, %v846_v56  ;;  %v948_v30 = vadd.f32 %v916_v51, %v847_v10  ;;  %v730_v0 = vmul.f32 %v2576_v47, %v2200_v24  ;;  %1901 = vmatprep.mubr.msk.bf16.mxu1 %vm1267_vm0, %v1222_v21  ;;  %v731_v8 = vmul.f32 %v2579_v19, %v2200_v24 }
  0x5f   : > { %v561_v32 = vadd.f32 %v529_v13, %v461_v22  ;;  %v562_v39 = vadd.f32 %v530_v63, %v462_v6  ;;  %v830_v26 = vmul.f32 %v2586_v42, %v2202_v25  ;;  %v831_v51 = vmul.f32 %v2589_v45, %v2202_v25 }
  0x60   : > { %v1047_v29 = vadd.f32 %v1015_v46, %v947_v9  ;;  %v1048_v48 = vadd.f32 %v1016_v57, %v948_v30  ;;  %v931_v4 = vmul.f32 %v2678_v16, %v2257_v53  ;;  %v932_v50 = vmul.f32 %v2683_v58, %v2257_v53  ;;  %v2698_v57 = vld [vmem:[%s2181_s29 + $0x13a] sm:$0xff] }
  0x61   : > { %v662_v55 = vadd.f32 %v630_v20, %v561_v32  ;;  %v663_v49 = vadd.f32 %v631_v31, %v562_v39  ;;  %v1031_v46 = vmul.f32 %v2688_v35, %v2259_v54  ;;  %v1032_v36 = vmul.f32 %v2693_v52, %v2259_v54 }
  0x62   : > { %v1147_v62 = vadd.f32 %v1115_v27, %v1047_v29  ;;  %v1148_v7 = vadd.f32 %v1116_v41, %v1048_v48  ;;  %v1131_v2 = vmul.f32 %v2218_v33, %v2698_v57  ;;  %v1132_v13 = vmul.f32 %v2218_v33, %v2703_v61 }
  0x63   : > { %v762_v56 = vadd.f32 %v730_v0, %v662_v55  ;;  %v763_v10 = vadd.f32 %v731_v8, %v663_v49  ;;  %v315_v63 = vmul.f32 %v2507_v3, %v2187_v15  ;;  %v316_v41 = vmul.f32 %v2512_v1, %v2187_v15  ;;  %v2737_v55 = vld [vmem:[%s2181_s29 + $0x90] sm:$0xff]  ;;  %v2740_v49 = vld [vmem:[%s2181_s29 + $0x98] sm:$0xff] }
  0x64   : > { %v1186_v21 = vadd.f32 %v2361_v12, %v1147_v62  ;;  %v1187_v27 = vadd.f32 %v2361_v12, %v1148_v7  ;;  %v415_v22 = vmul.f32 %v2517_v28, %v2190_v17  ;;  %v416_v9 = vmul.f32 %v2522_v38, %v2190_v17 }
  0x65   : > { %v862_v6 = vadd.f32 %v830_v26, %v762_v56  ;;  %v863_v20 = vadd.f32 %v831_v51, %v763_v10  ;;  %v515_v30 = vmul.f32 %v2527_v43, %v2192_v18  ;;  %v516_v0 = vmul.f32 %v2532_v44, %v2192_v18  ;;  %v2750_v56 = vld [vmem:[%s2181_s29 + $0x99] sm:$0xff] }
  0x66   : > { %v1215_v31 = vpack.c.bf16 %v1187_v27, %v1186_v21  ;;  %v447_v3 = vadd.f32 %v415_v22, %v315_v63  ;;  %v616_v1 = vmul.f32 %v2621_v40, %v2198_v23  ;;  %v448_v39 = vadd.f32 %v416_v9, %v316_v41  ;;  %v2757_v41 = vld [vmem:[%s2181_s29 + $0x92] sm:$0xff]  ;;  %v2760_v22 = vld [vmem:[%s2181_s29 + $0x9a] sm:$0xff] }
  0x67   : > { %v963_v28 = vadd.f32 %v931_v4, %v862_v6  ;;  %v964_v32 = vadd.f32 %v932_v50, %v863_v20  ;;  %v617_v38 = vmul.f32 %v2624_v59, %v2198_v23  ;;  %v716_v8 = vmul.f32 %v2633_v11, %v2200_v24  ;;  %v2743_v50 = vld [vmem:[%s2181_s29 + $0x91] sm:$0xff] }
  0x68   : > { %1886 = vmatmul.mubr.msk.bf16.gmra.mrb[4].mxu0 %vm1267_vm0, %v1215_v31  ;;  %v547_v43 = vadd.f32 %v515_v30, %v447_v3  ;;  %v717_v44 = vmul.f32 %v2636_v5, %v2200_v24  ;;  %v816_v26 = vmul.f32 %v2641_v34, %v2202_v25  ;;  %v548_v51 = vadd.f32 %v516_v0, %v448_v39 }
  0x69   : > { %v1063_v29 = vadd.f32 %v1031_v46, %v963_v28  ;;  %v1064_v48 = vadd.f32 %v1032_v36, %v964_v32  ;;  %v817_v4 = vmul.f32 %v2644_v37, %v2202_v25  ;;  %v917_v7 = vmul.f32 %v2737_v55, %v2257_v53 }
  0x6a   : > { %v648_v62 = vadd.f32 %v616_v1, %v547_v43  ;;  %v918_v46 = vmul.f32 %v2740_v49, %v2257_v53  ;;  %v1017_v36 = vmul.f32 %v2743_v50, %v2259_v54  ;;  %v649_v21 = vadd.f32 %v617_v38, %v548_v51 }
  0x6b   : > { %v1163_v10 = vadd.f32 %v1131_v2, %v1063_v29  ;;  %v1164_v63 = vadd.f32 %v1132_v13, %v1064_v48  ;;  %v1018_v27 = vmul.f32 %v2750_v56, %v2259_v54  ;;  %v1117_v20 = vmul.f32 %v2218_v33, %v2757_v41 }
  0x6c   : > { %v748_v6 = vadd.f32 %v716_v8, %v648_v62  ;;  %v1118_v9 = vmul.f32 %v2218_v33, %v2760_v22  ;;  %v331_v30 = vmul.f32 %v2566_v60, %v2187_v15  ;;  %v749_v31 = vadd.f32 %v717_v44, %v649_v21  ;;  %v2794_v62 = vld [vmem:[%s2181_s29 + $0x150] sm:$0xff]  ;;  %v2807_v21 = vld [vmem:[%s2181_s29 + $0x159] sm:$0xff] }
  0x6d   : > { %v1202_v2 = vadd.f32 %v2361_v12, %v1163_v10  ;;  %v1203_v13 = vadd.f32 %v2361_v12, %v1164_v63  ;;  %v332_v3 = vmul.f32 %v2569_v14, %v2187_v15  ;;  %v431_v1 = vmul.f32 %v2576_v47, %v2190_v17 }
  0x6e   : > { %v848_v0 = vadd.f32 %v816_v26, %v748_v6  ;;  %v432_v28 = vmul.f32 %v2579_v19, %v2190_v17  ;;  %v531_v32 = vmul.f32 %v2586_v42, %v2192_v18  ;;  %v849_v60 = vadd.f32 %v817_v4, %v749_v31 }
  0x6f   : > { %v1223_v39 = vpack.c.bf16 %v1203_v13, %v1202_v2  ;;  %v532_v38 = vmul.f32 %v2589_v45, %v2192_v18  ;;  %v632_v14 = vmul.f32 %v2678_v16, %v2198_v23  ;;  %v463_v8 = vadd.f32 %v431_v1, %v331_v30 }
  0x70   : > { %v949_v43 = vadd.f32 %v917_v7, %v848_v0  ;;  %v464_v47 = vadd.f32 %v432_v28, %v332_v3  ;;  %v633_v19 = vmul.f32 %v2683_v58, %v2198_v23  ;;  %v950_v42 = vadd.f32 %v918_v46, %v849_v60  ;;  %v2797_v7 = vld [vmem:[%s2181_s29 + $0x158] sm:$0xff] }
  0x71   : > { %1902 = vmatmul.mubr.msk.bf16.gmra.mrb[4].mxu1 %vm1267_vm0, %v1223_v39  ;;  %v732_v44 = vmul.f32 %v2688_v35, %v2200_v24  ;;  %v733_v45 = vmul.f32 %v2693_v52, %v2200_v24  ;;  %v832_v26 = vmul.f32 %v2698_v57, %v2202_v25  ;;  %v563_v48 = vadd.f32 %v531_v32, %v463_v8  ;;  %v2800_v46 = vld [vmem:[%s2181_s29 + $0x151] sm:$0xff] }
  0x72   : > { %v1049_v29 = vadd.f32 %v1017_v36, %v949_v43  ;;  %v564_v51 = vadd.f32 %v532_v38, %v464_v47  ;;  %v833_v4 = vmul.f32 %v2703_v61, %v2202_v25  ;;  %v1050_v10 = vadd.f32 %v1018_v27, %v950_v42  ;;  %v2814_v3 = vld [vmem:[%s2181_s29 + $0x152] sm:$0xff]  ;;  %v2817_v27 = vld [vmem:[%s2181_s29 + $0x15a] sm:$0xff] }
  0x73   : > { %v933_v63 = vmul.f32 %v2794_v62, %v2257_v53  ;;  %v934_v36 = vmul.f32 %v2797_v7, %v2257_v53  ;;  %v1033_v6 = vmul.f32 %v2800_v46, %v2259_v54  ;;  %v664_v2 = vadd.f32 %v632_v14, %v563_v48 }
  0x74   : > { %v1149_v30 = vadd.f32 %v1117_v20, %v1049_v29  ;;  %v665_v13 = vadd.f32 %v633_v19, %v564_v51  ;;  %v1034_v31 = vmul.f32 %v2807_v21, %v2259_v54  ;;  %v1150_v0 = vadd.f32 %v1118_v9, %v1050_v10  ;;  %v2851_v10 = vld [vmem:[%s2181_s29 + $0xa8] sm:$0xff] }
  0x75   : > { %v1133_v1 = vmul.f32 %v2218_v33, %v2814_v3  ;;  %v1134_v28 = vmul.f32 %v2218_v33, %v2817_v27  ;;  %v317_v32 = vmul.f32 %v2621_v40, %v2187_v15  ;;  %v764_v39 = vadd.f32 %v732_v44, %v664_v2 }
  0x76   : > { %v1188_v20 = vadd.f32 %v2361_v12, %v1149_v30  ;;  %v765_v60 = vadd.f32 %v733_v45, %v665_v13  ;;  %v318_v38 = vmul.f32 %v2624_v59, %v2187_v15  ;;  %v1189_v14 = vadd.f32 %v2361_v12, %v1150_v0  ;;  %v2861_v0 = vld [vmem:[%s2181_s29 + $0xa9] sm:$0xff] }
  0x77   : > { %v417_v9 = vmul.f32 %v2633_v11, %v2190_v17  ;;  %v418_v43 = vmul.f32 %v2636_v5, %v2190_v17  ;;  %v517_v8 = vmul.f32 %v2641_v34, %v2192_v18  ;;  %v864_v47 = vadd.f32 %v832_v26, %v764_v39 }
  0x78   : > { %v865_v40 = vadd.f32 %v833_v4, %v765_v60  ;;  %v518_v19 = vmul.f32 %v2644_v37, %v2192_v18  ;;  %v618_v59 = vmul.f32 %v2737_v55, %v2198_v23  ;;  %v1216_v42 = vpack.c.bf16 %v1189_v14, %v1188_v20 }
  0x79   : > { %v449_v44 = vadd.f32 %v417_v9, %v317_v32  ;;  %v450_v45 = vadd.f32 %v418_v43, %v318_v38  ;;  %v619_v11 = vmul.f32 %v2740_v49, %v2198_v23  ;;  %v965_v5 = vadd.f32 %v933_v63, %v864_v47  ;;  %v2854_v63 = vld [vmem:[%s2181_s29 + $0xb0] sm:$0xff] }
  0x7a   : > { %v966_v34 = vadd.f32 %v934_v36, %v865_v40  ;;  %v718_v26 = vmul.f32 %v2743_v50, %v2200_v24  ;;  %v719_v37 = vmul.f32 %v2750_v56, %v2200_v24  ;;  %1889 = vmatprep.mubr.msk.bf16.mxu0 %vm1267_vm0, %v1216_v42  ;;  %v818_v51 = vmul.f32 %v2757_v41, %v2202_v25  ;;  %v2864_v32 = vld [vmem:[%s2181_s29 + $0xb1] sm:$0xff] }
  0x7b   : > { %v549_v29 = vadd.f32 %v517_v8, %v449_v44  ;;  %v550_v48 = vadd.f32 %v518_v19, %v450_v45  ;;  %v819_v4 = vmul.f32 %v2760_v22, %v2202_v25  ;;  %v1065_v36 = vadd.f32 %v1033_v6, %v965_v5  ;;  %v2871_v6 = vld [vmem:[%s2181_s29 + $0xaa] sm:$0xff] }
  0x7c   : > { %v1066_v30 = vadd.f32 %v1034_v31, %v966_v34  ;;  %v919_v2 = vmul.f32 %v2851_v10, %v2257_v53  ;;  %v920_v13 = vmul.f32 %v2854_v63, %v2257_v53  ;;  %v1019_v60 = vmul.f32 %v2861_v0, %v2259_v54  ;;  %v2874_v31 = vld [vmem:[%s2181_s29 + $0xb2] sm:$0xff] }
  0x7d   : > { %v650_v20 = vadd.f32 %v618_v59, %v549_v29  ;;  %v651_v39 = vadd.f32 %v619_v11, %v550_v48  ;;  %v1020_v38 = vmul.f32 %v2864_v32, %v2259_v54  ;;  %v1165_v14 = vadd.f32 %v1133_v1, %v1065_v36 }
  0x7e   : > { %v1166_v9 = vadd.f32 %v1134_v28, %v1066_v30  ;;  %v1119_v43 = vmul.f32 %v2218_v33, %v2871_v6  ;;  %v1120_v8 = vmul.f32 %v2218_v33, %v2874_v31  ;;  %v333_v19 = vmul.f32 %v2678_v16, %v2187_v15 }
  0x7f   : > { %v750_v47 = vadd.f32 %v718_v26, %v650_v20  ;;  %v751_v40 = vadd.f32 %v719_v37, %v651_v39  ;;  %v334_v59 = vmul.f32 %v2683_v58, %v2187_v15  ;;  %v1204_v42 = vadd.f32 %v2361_v12, %v1165_v14  ;;  %v2916_v39 = vld [vmem:[%s2181_s29 + $0x169] sm:$0xff] }
  0x80   : > { %v1205_v44 = vadd.f32 %v2361_v12, %v1166_v9  ;;  %v433_v1 = vmul.f32 %v2688_v35, %v2190_v17  ;;  %v434_v28 = vmul.f32 %v2693_v52, %v2190_v17  ;;  %v533_v11 = vmul.f32 %v2698_v57, %v2192_v18 }
  0x81   : > { %v850_v45 = vadd.f32 %v818_v51, %v750_v47  ;;  %v851_v33 = vadd.f32 %v819_v4, %v751_v40  ;;  %v534_v16 = vmul.f32 %v2703_v61, %v2192_v18  ;;  %v634_v26 = vmul.f32 %v2794_v62, %v2198_v23  ;;  %v2906_v4 = vld [vmem:[%s2181_s29 + $0x168] sm:$0xff]  ;;  %v2921_v40 = vld [vmem:[%s2181_s29 + $0x171] sm:$0xff] }
  0x82   : > { %v1224_v58 = vpack.c.bf16 %v1205_v44, %v1204_v42  ;;  %v465_v5 = vadd.f32 %v433_v1, %v333_v19  ;;  %v466_v34 = vadd.f32 %v434_v28, %v334_v59  ;;  %v635_v52 = vmul.f32 %v2797_v7, %v2198_v23  ;;  %v2931_v44 = vld [vmem:[%s2181_s29 + $0x172] sm:$0xff]  ;;  %v2936_v1 = vld [vmem:[%s3277_s1 + $0x8] ss:$0 sm:$0xff] }
  0x83   : > { %v951_v35 = vadd.f32 %v919_v2, %v850_v45  ;;  %v952_v37 = vadd.f32 %v920_v13, %v851_v33  ;;  %v734_v29 = vmul.f32 %v2800_v46, %v2200_v24  ;;  %v735_v48 = vmul.f32 %v2807_v21, %v2200_v24  ;;  %v2911_v13 = vld [vmem:[%s2181_s29 + $0x170] sm:$0xff] }
  0x84   : > { %1905 = vmatprep.mubr.msk.bf16.mxu1 %vm1267_vm0, %v1224_v58  ;;  %v565_v57 = vadd.f32 %v533_v11, %v465_v5  ;;  %v566_v61 = vadd.f32 %v534_v16, %v466_v34  ;;  %v834_v51 = vmul.f32 %v2814_v3, %v2202_v25  ;;  %v835_v2 = vmul.f32 %v2817_v27, %v2202_v25 }
  0x85   : > { %v1051_v36 = vadd.f32 %v1019_v60, %v951_v35  ;;  %v1052_v30 = vadd.f32 %v1020_v38, %v952_v37  ;;  %v935_v20 = vmul.f32 %v2906_v4, %v2257_v53  ;;  %v936_v47 = vmul.f32 %v2911_v13, %v2257_v53  ;;  %v2926_v38 = vld [vmem:[%s2181_s29 + $0x16a] sm:$0xff] }
  0x86   : > { %v666_v14 = vadd.f32 %v634_v26, %v565_v57  ;;  %v667_v9 = vadd.f32 %v635_v52, %v566_v61  ;;  %v1035_v60 = vmul.f32 %v2916_v39, %v2259_v54  ;;  %v1036_v42 = vmul.f32 %v2921_v40, %v2259_v54 }
  0x87   : > { %v1151_v19 = vadd.f32 %v1119_v43, %v1051_v36  ;;  %v1152_v59 = vadd.f32 %v1120_v8, %v1052_v30  ;;  %v1135_v28 = vmul.f32 %v2936_v1, %v2926_v38  ;;  %v1136_v11 = vmul.f32 %v2936_v1, %v2931_v44 }
  0x88   : > { %v766_v45 = vadd.f32 %v734_v29, %v666_v14  ;;  %v767_v33 = vadd.f32 %v735_v48, %v667_v9  ;;  %v319_v43 = vmul.f32 %v2737_v55, %v2187_v15  ;;  %v320_v58 = vmul.f32 %v2740_v49, %v2187_v15  ;;  %v2971_v14 = vld [vmem:[%s2181_s29 + $0xc8] sm:$0xff] }
  0x89   : > { %v1190_v8 = vadd.f32 %v2361_v12, %v1151_v19  ;;  %v1191_v16 = vadd.f32 %v2361_v12, %v1152_v59  ;;  %v419_v5 = vmul.f32 %v2743_v50, %v2190_v17  ;;  %v420_v35 = vmul.f32 %v2750_v56, %v2190_v17  ;;  %v2980_v59 = vld [vmem:[%s2181_s29 + $0xc1] sm:$0xff] }
  0x8a   : > { %v866_v34 = vadd.f32 %v834_v51, %v766_v45  ;;  %v867_v26 = vadd.f32 %v835_v2, %v767_v33  ;;  %v519_v37 = vmul.f32 %v2757_v41, %v2192_v18  ;;  %v520_v29 = vmul.f32 %v2760_v22, %v2192_v18 }
  0x8b   : > { %v1217_v52 = vpack.c.bf16 %v1191_v16, %v1190_v8  ;;  %v451_v55 = vadd.f32 %v419_v5, %v319_v43  ;;  %v620_v49 = vmul.f32 %v2851_v10, %v2198_v23  ;;  %v452_v61 = vadd.f32 %v420_v35, %v320_v58  ;;  %v2983_v43 = vld [vmem:[%s2181_s29 + $0xc9] sm:$0xff] }
  0x8c   : > { %v967_v57 = vadd.f32 %v935_v20, %v866_v34  ;;  %v968_v50 = vadd.f32 %v936_v47, %v867_v26  ;;  %v621_v56 = vmul.f32 %v2854_v63, %v2198_v23  ;;  %v720_v48 = vmul.f32 %v2861_v0, %v2200_v24  ;;  %v2968_v20 = vld [vmem:[%s2181_s29 + $0xc0] sm:$0xff] }
  0x8d   : > { %1890 = vmatmul.mubr.msk.bf16.gmra.mrb[8].mxu0 %vm1267_vm0, %v1217_v52  ;;  %v551_v41 = vadd.f32 %v519_v37, %v451_v55  ;;  %v721_v22 = vmul.f32 %v2864_v32, %v2200_v24  ;;  %v552_v30 = vadd.f32 %v520_v29, %v452_v61  ;;  %v820_v2 = vmul.f32 %v2871_v6, %v2202_v25  ;;  %v2988_v16 = vld [vmem:[%s2181_s29 + $0xc2] sm:$0xff]  ;;  %v3011_v61 = vld [vmem:[%s2181_s29 + $0xca] sm:$0xff] }
  0x8e   : > { %v1067_v51 = vadd.f32 %v1035_v60, %v967_v57  ;;  %v1068_v36 = vadd.f32 %v1036_v42, %v968_v50  ;;  %v821_v47 = vmul.f32 %v2874_v31, %v2202_v25  ;;  %v921_v19 = vmul.f32 %v2968_v20, %v2257_v53 }
  0x8f   : > { %v652_v9 = vadd.f32 %v620_v49, %v551_v41  ;;  %v922_v60 = vmul.f32 %v2971_v14, %v2257_v53  ;;  %v653_v33 = vadd.f32 %v621_v56, %v552_v30  ;;  %v1021_v8 = vmul.f32 %v2980_v59, %v2259_v54 }
  0x90   : > { %v1167_v42 = vadd.f32 %v1135_v28, %v1067_v51  ;;  %v1168_v45 = vadd.f32 %v1136_v11, %v1068_v36  ;;  %v1022_v5 = vmul.f32 %v2983_v43, %v2259_v54  ;;  %v1121_v34 = vmul.f32 %v2936_v1, %v2988_v16 }
  0x91   : > { %v752_v58 = vadd.f32 %v720_v48, %v652_v9  ;;  %v335_v28 = vmul.f32 %v2794_v62, %v2187_v15  ;;  %v753_v35 = vadd.f32 %v721_v22, %v653_v33  ;;  %v336_v37 = vmul.f32 %v2797_v7, %v2187_v15  ;;  %v3028_v9 = vld [vmem:[%s2181_s29 + $0x188] sm:$0xff] }
  0x92   : > { %v1206_v11 = vadd.f32 %v2361_v12, %v1167_v42  ;;  %v1207_v26 = vadd.f32 %v2361_v12, %v1168_v45  ;;  %v435_v55 = vmul.f32 %v2800_v46, %v2190_v17  ;;  %v436_v29 = vmul.f32 %v2807_v21, %v2190_v17  ;;  %v3037_v45 = vld [vmem:[%s2181_s29 + $0x181] sm:$0xff] }
  0x93   : > { %v852_v52 = vadd.f32 %v820_v2, %v752_v58  ;;  %v535_v49 = vmul.f32 %v2814_v3, %v2192_v18  ;;  %v853_v62 = vadd.f32 %v821_v47, %v753_v35  ;;  %v536_v50 = vmul.f32 %v2817_v27, %v2192_v18  ;;  %v3025_v2 = vld [vmem:[%s2181_s29 + $0x180] sm:$0xff] }
  0x94   : > { %v1225_v57 = vpack.c.bf16 %v1207_v26, %v1206_v11  ;;  %v636_v12 = vmul.f32 %v2906_v4, %v2198_v23  ;;  %v467_v46 = vadd.f32 %v435_v55, %v335_v28  ;;  %v468_v56 = vadd.f32 %v436_v29, %v336_v37  ;;  %v3040_v28 = vld [vmem:[%s2181_s29 + $0x189] sm:$0xff] }
  0x95   : > { %v953_v7 = vadd.f32 %v921_v19, %v852_v52  ;;  %v637_v21 = vmul.f32 %v2911_v13, %v2198_v23  ;;  %v954_v3 = vadd.f32 %v922_v60, %v853_v62  ;;  %v1122_v27 = vmul.f32 %v2936_v1, %v3011_v61  ;;  %v3056_v52 = vld [vmem:[%s3278_s2] ss:$0 sm:$0xff] }
  0x96   : > { %1906 = vmatmul.mubr.msk.bf16.gmra.mrb[8].mxu1 %vm1267_vm0, %v1225_v57  ;;  %v736_v41 = vmul.f32 %v2916_v39, %v2200_v24  ;;  %v737_v48 = vmul.f32 %v2921_v40, %v2200_v24  ;;  %v567_v51 = vadd.f32 %v535_v49, %v467_v46  ;;  %v568_v36 = vadd.f32 %v536_v50, %v468_v56 }
  0x97   : > { %v1053_v22 = vadd.f32 %v1021_v8, %v953_v7  ;;  %v836_v30 = vmul.f32 %v2926_v38, %v2202_v25  ;;  %v1054_v47 = vadd.f32 %v1022_v5, %v954_v3  ;;  %v837_v19 = vmul.f32 %v2931_v44, %v2202_v25  ;;  %v3045_v5 = vld [vmem:[%s2181_s29 + $0x182] sm:$0xff]  ;;  %v3073_v3 = vld [vmem:[%s2181_s29 + $0x18a] sm:$0xff] }
  0x98   : > { %v937_v60 = vmul.f32 %v3025_v2, %v2257_v53  ;;  %v938_v42 = vmul.f32 %v3028_v9, %v2257_v53  ;;  %v668_v8 = vadd.f32 %v636_v12, %v567_v51  ;;  %v669_v58 = vadd.f32 %v637_v21, %v568_v36  ;;  %v1774_v51 = vld [vmem:[%s2181_s29 + $0xd9] sm:$0xff] }
  0x99   : > { %v1153_v33 = vadd.f32 %v1121_v34, %v1053_v22  ;;  %v1037_v11 = vmul.f32 %v3037_v45, %v2259_v54  ;;  %v1154_v26 = vadd.f32 %v1122_v27, %v1054_v47  ;;  %v1038_v35 = vmul.f32 %v3040_v28, %v2259_v54 }
  0x9a   : > { %v1137_v37 = vmul.f32 %v2936_v1, %v3045_v5  ;;  %v321_v34 = vmul.f32 %v2851_v10, %v2187_v15  ;;  %v768_v29 = vadd.f32 %v736_v41, %v668_v8  ;;  %v769_v49 = vadd.f32 %v737_v48, %v669_v58 }
  0x9b   : > { %v1192_v55 = vadd.f32 %v3056_v52, %v1153_v33  ;;  %v322_v57 = vmul.f32 %v2854_v63, %v2187_v15  ;;  %v1193_v62 = vadd.f32 %v3056_v52, %v1154_v26  ;;  %v421_v50 = vmul.f32 %v2861_v0, %v2190_v17 }
  0x9c   : > { %v422_v10 = vmul.f32 %v2864_v32, %v2190_v17  ;;  %v521_v12 = vmul.f32 %v2871_v6, %v2192_v18  ;;  %v868_v7 = vadd.f32 %v836_v30, %v768_v29  ;;  %v869_v46 = vadd.f32 %v837_v19, %v769_v49  ;;  %v1742_v6 = vld [vmem:[%s2181_s29 + $0xd8] sm:$0xff]  ;;  %v1775_v19 = vld [vmem:[%s2181_s29 + $0xe1] sm:$0xff] }
  0x9d   : > { %v522_v56 = vmul.f32 %v2874_v31, %v2192_v18  ;;  %v622_v63 = vmul.f32 %v2968_v20, %v2198_v23  ;;  %v1218_v21 = vpack.c.bf16 %v1193_v62, %v1192_v55  ;;  %v453_v0 = vadd.f32 %v421_v50, %v321_v34  ;;  %v1743_v20 = vld [vmem:[%s2181_s29 + $0xe0] sm:$0xff] }
  0x9e   : > { %v454_v32 = vadd.f32 %v422_v10, %v322_v57  ;;  %v623_v27 = vmul.f32 %v2971_v14, %v2198_v23  ;;  %v969_v41 = vadd.f32 %v937_v60, %v868_v7  ;;  %v970_v48 = vadd.f32 %v938_v42, %v869_v46  ;;  %v1806_v60 = vld [vmem:[%s2181_s29 + $0xda] sm:$0xff]  ;;  %v1807_v10 = vld [vmem:[%s2181_s29 + $0xe2] sm:$0xff] }
  0x9f   : > { %v1138_v22 = vmul.f32 %v2936_v1, %v3073_v3  ;;  %v722_v31 = vmul.f32 %v2980_v59, %v2200_v24  ;;  %1893 = vmatprep.mubr.msk.bf16.mxu0 %vm1267_vm0, %v1218_v21  ;;  %v553_v36 = vadd.f32 %v521_v12, %v453_v0  ;;  %v723_v47 = vmul.f32 %v2983_v43, %v2200_v24 }
  0xa0   : > { %v554_v30 = vadd.f32 %v522_v56, %v454_v32  ;;  %v822_v14 = vmul.f32 %v2988_v16, %v2202_v25  ;;  %v1069_v42 = vadd.f32 %v1037_v11, %v969_v41  ;;  %v1070_v33 = vadd.f32 %v1038_v35, %v970_v48  ;;  %v1759_v41 = vld [vmem:[%s2181_s29 + $0x1a0] sm:$0xff] }
  0xa1   : > { %v823_v8 = vmul.f32 %v3011_v61, %v2202_v25  ;;  %v923_v59 = vmul.f32 %v1742_v6, %v2257_v53  ;;  %v654_v58 = vadd.f32 %v622_v63, %v553_v36  ;;  %v924_v34 = vmul.f32 %v1743_v20, %v2257_v53  ;;  %v1758_v6 = vld [vmem:[%s2181_s29 + $0x198] sm:$0xff] }
  0xa2   : > { %v655_v26 = vadd.f32 %v623_v27, %v554_v30  ;;  %v1023_v55 = vmul.f32 %v1774_v51, %v2259_v54  ;;  %v1169_v43 = vadd.f32 %v1137_v37, %v1069_v42  ;;  %v1170_v29 = vadd.f32 %v1138_v22, %v1070_v33  ;;  %v1791_v51 = vld [vmem:[%s2181_s29 + $0x1a1] sm:$0xff] }
  0xa3   : > { %v1024_v16 = vmul.f32 %v1775_v19, %v2259_v54  ;;  %v1123_v49 = vmul.f32 %v2936_v1, %v1806_v60  ;;  %v754_v11 = vadd.f32 %v722_v31, %v654_v58  ;;  %v337_v61 = vmul.f32 %v2906_v4, %v2187_v15  ;;  %v1822_v19 = vld [vmem:[%s2181_s29 + $0x19a] sm:$0xff]  ;;  %v1823_v60 = vld [vmem:[%s2181_s29 + $0x1a2] sm:$0xff] }
  0xa4   : > { %v755_v35 = vadd.f32 %v723_v47, %v655_v26  ;;  %v338_v57 = vmul.f32 %v2911_v13, %v2187_v15  ;;  %v1208_v62 = vadd.f32 %v3056_v52, %v1169_v43  ;;  %v1209_v50 = vadd.f32 %v3056_v52, %v1170_v29 }
  0xa5   : > { %v437_v37 = vmul.f32 %v2916_v39, %v2190_v17  ;;  %v438_v12 = vmul.f32 %v2921_v40, %v2190_v17  ;;  %v854_v7 = vadd.f32 %v822_v14, %v754_v11  ;;  %v537_v56 = vmul.f32 %v2926_v38, %v2192_v18 }
  0xa6   : > { %v855_v46 = vadd.f32 %v823_v8, %v755_v35  ;;  %v538_v4 = vmul.f32 %v2931_v44, %v2192_v18  ;;  %v1226_v15 = vpack.c.bf16 %v1209_v50, %v1208_v62  ;;  %v638_v21 = vmul.f32 %v3025_v2, %v2198_v23 }
  0xa7   : > { %v469_v13 = vadd.f32 %v437_v37, %v337_v61  ;;  %v470_v63 = vadd.f32 %v438_v12, %v338_v57  ;;  %v955_v39 = vadd.f32 %v923_v59, %v854_v7  ;;  %v1124_v17 = vmul.f32 %v2936_v1, %v1807_v10 }
  0xa8   : > { %v956_v0 = vadd.f32 %v924_v34, %v855_v46  ;;  %v639_v40 = vmul.f32 %v3028_v9, %v2198_v23  ;;  %1909 = vmatprep.mubr.msk.bf16.mxu1 %vm1267_vm0, %v1226_v15  ;;  %v738_v44 = vmul.f32 %v3037_v45, %v2200_v24  ;;  %v739_v32 = vmul.f32 %v3040_v28, %v2200_v24  ;;  %v1790_v45 = vld [vmem:[%s2181_s29 + $0x199] sm:$0xff]  ;;  %s1524_s29 = sshll.u32 %s3155_s25, 4  ;;  %s3222_s29 = int_to_ptr.vmem [resolvable:$true] %s1524_s29 }
  0xa9   : > { %v569_v18 = vadd.f32 %v537_v56, %v469_v13  ;;  %v570_v38 = vadd.f32 %v538_v4, %v470_v63  ;;  %v1055_v2 = vadd.f32 %v1023_v55, %v955_v39  ;;  %v838_v9 = vmul.f32 %v3045_v5, %v2202_v25  ;;  %s1985_s10 = scalar_lea.vmem %s3222_s29, 4096  ;;  %p1992_p1 = scmp.lt.s32.totalorder %s3222_s29, %s1990_s12 }
  0xaa   : > { %v1056_v27 = vadd.f32 %v1024_v16, %v956_v0  ;;  %v839_v22 = vmul.f32 %v3073_v3, %v2202_v25  ;;  %v939_v28 = vmul.f32 %v1758_v6, %v2257_v53  ;;  %v940_v30 = vmul.f32 %v1759_v41, %v2257_v53  ;;  %p1986_p12 = scmp.ne.s32.totalorder %s3222_s29, %s1985_s10  ;;  %p1993_p2 = scmp.lt.s32.totalorder %s1991_s13, %s1985_s10 }
  0xab   : > { %v670_v48 = vadd.f32 %v638_v21, %v569_v18  ;;  %v671_v23 = vadd.f32 %v639_v40, %v570_v38  ;;  %v1155_v31 = vadd.f32 %v1123_v49, %v1055_v2  ;;  %v1039_v25 = vmul.f32 %v1790_v45, %v2259_v54 }
  0xac   : > { %v1156_v20 = vadd.f32 %v1124_v17, %v1056_v27  ;;  %v1040_v3 = vmul.f32 %v1791_v51, %v2259_v54  ;;  %v1139_v58 = vmul.f32 %v2936_v1, %v1822_v19  ;;  %v1140_v53 = vmul.f32 %v2936_v1, %v1823_v60  ;;  %v3151_v54 = vld [vmem:[%s3280_s4] ss:$0 sm:$0xff]  ;;  %p1987_p13 = pnand %p1986_p12, %p2138_p4  ;;  %p1994_p3 = por %p1993_p2, %p1992_p1 }
  0xad   : > { %v770_v36 = vadd.f32 %v738_v44, %v670_v48  ;;  %v771_v24 = vadd.f32 %v739_v32, %v671_v23  ;;  %v1194_v47 = vadd.f32 %v3056_v52, %v1155_v31 }
  0xae   : > { %v1195_v14 = vadd.f32 %v3056_v52, %v1156_v20  ;;  %p1988_p0 = pneg %p1987_p13 }
  0xaf   : > { %v870_v5 = vadd.f32 %v838_v9, %v770_v36  ;;  %v871_v42 = vadd.f32 %v839_v22, %v771_v24 }
  0xb0   : > { %v1219_v33 = vpack.c.bf16 %v1195_v14, %v1194_v47  ;;  %p1995_p5 = pnand %p1994_p3, %p1988_p0 }
  0xb1   : > { %v971_v8 = vadd.f32 %v939_v28, %v870_v5  ;;  %v972_v59 = vadd.f32 %v940_v30, %v871_v42 }
  0xb2   : > { %1894 = vmatmul.mubr.msk.bf16.gmra.mrb[12].mxu0 %vm1267_vm0, %v1219_v33 }
  0xb3   : > { %v1071_v26 = vadd.f32 %v1039_v25, %v971_v8  ;;  %v1072_v34 = vadd.f32 %v1040_v3, %v972_v59 }
  0xb5   : > { %v1171_v55 = vadd.f32 %v1139_v58, %v1071_v26  ;;  %v1172_v43 = vadd.f32 %v1140_v53, %v1072_v34 }
  0xb7   : > { %v1210_v29 = vadd.f32 %v3056_v52, %v1171_v55  ;;  %v1211_v16 = vadd.f32 %v3056_v52, %v1172_v43 }
  0xb9   : > { %v1227_v49 = vpack.c.bf16 %v1211_v16, %v1210_v29 }
  0xbb   : > { %1910 = vmatmul.mubr.msk.bf16.gmra.mrb[12].mxu1 %vm1267_vm0, %v1227_v49 }
 0x115   : > { %v1883_v1 = vpop.f32.mrb[0].mxu0 }
 0x116   : > { %v1359_v11 = vadd.f32 %v1883_v1, %v3151_v54  ;;  %v1350_v35 = vpop.f32.mrb[1].mxu0 }
 0x117   : > { %v1351_v61 = vadd.f32 %v3151_v54, %v1350_v35  ;;  %v1884_v57 = vpop.f32.mrb[2].mxu0 }
 0x118   : > { %1479 = vst [vmem:[%s3155_s25 + $0x10] sm:$0xff] %v1359_v11  ;;  %v1362_v52 = vadd.f32 %v1884_v57, %v3151_v54  ;;  %v1353_v62 = vpop.f32.mrb[3].mxu0 }
 0x119   : > { %1477 = vst [vmem:[%s3155_s25] sm:$0xff] %v1351_v61  ;;  %v1354_v50 = vadd.f32 %v3151_v54, %v1353_v62 }
 0x11a   : > { %1480 = vst [vmem:[%s3155_s25 + $0x18] sm:$0xff] %v1362_v52 }
 0x11b   : > { %1478 = vst [vmem:[%s3155_s25 + $0x8] sm:$0xff] %v1354_v50 }
 0x120   : > { %v1899_v10 = vpop.f32.mrb[0].mxu1 }
 0x121   : > { %v1423_v37 = vadd.f32 %v1899_v10, %v3151_v54  ;;  %v1414_v12 = vpop.f32.mrb[1].mxu1 }
 0x122   : > { %v1415_v7 = vadd.f32 %v3151_v54, %v1414_v12  ;;  %v1900_v46 = vpop.f32.mrb[2].mxu1 }
 0x123   : > { %1495 = vst [vmem:[%s3155_s25 + $0x90] sm:$0xff] %v1423_v37  ;;  %v1426_v56 = vadd.f32 %v1900_v46, %v3151_v54  ;;  %v1417_v4 = vpop.f32.mrb[3].mxu1 }
 0x124   : > { %1493 = vst [vmem:[%s3155_s25 + $0x80] sm:$0xff] %v1415_v7  ;;  %v1418_v15 = vadd.f32 %v3151_v54, %v1417_v4 }
 0x125   : > { %1496 = vst [vmem:[%s3155_s25 + $0x98] sm:$0xff] %v1426_v56 }
 0x126   : > { %1494 = vst [vmem:[%s3155_s25 + $0x88] sm:$0xff] %v1418_v15 }
 0x13b   : > { %v1887_v13 = vpop.f32.mrb[4].mxu0 }
 0x13c   : > { %v1375_v63 = vadd.f32 %v1887_v13, %v3151_v54  ;;  %v1366_v21 = vpop.f32.mrb[5].mxu0 }
 0x13d   : > { %v1367_v39 = vadd.f32 %v3151_v54, %v1366_v21  ;;  %v1888_v0 = vpop.f32.mrb[6].mxu0 }
 0x13e   : > { %1483 = vst [vmem:[%s3155_s25 + $0x30] sm:$0xff] %v1375_v63  ;;  %v1378_v17 = vadd.f32 %v1888_v0, %v3151_v54  ;;  %v1369_v40 = vpop.f32.mrb[7].mxu0 }
 0x13f   : > { %1481 = vst [vmem:[%s3155_s25 + $0x20] sm:$0xff] %v1367_v39  ;;  %v1370_v18 = vadd.f32 %v3151_v54, %v1369_v40 }
 0x140   : > { %1484 = vst [vmem:[%s3155_s25 + $0x38] sm:$0xff] %v1378_v17 }
 0x141   : > { %1482 = vst [vmem:[%s3155_s25 + $0x28] sm:$0xff] %v1370_v18 }
 0x144   : > { %v1903_v38 = vpop.f32.mrb[4].mxu1 }
 0x145   : > { %v1439_v44 = vadd.f32 %v1903_v38, %v3151_v54  ;;  %v1430_v32 = vpop.f32.mrb[5].mxu1 }
 0x146   : > { %v1431_v2 = vadd.f32 %v3151_v54, %v1430_v32  ;;  %v1904_v27 = vpop.f32.mrb[6].mxu1 }
 0x147   : > { %1499 = vst [vmem:[%s3155_s25 + $0xb0] sm:$0xff] %v1439_v44  ;;  %v1442_v6 = vadd.f32 %v1904_v27, %v3151_v54  ;;  %v1433_v41 = vpop.f32.mrb[7].mxu1 }
 0x148   : > { %1497 = vst [vmem:[%s3155_s25 + $0xa0] sm:$0xff] %v1431_v2  ;;  %v1434_v48 = vadd.f32 %v3151_v54, %v1433_v41 }
 0x149   : > { %1500 = vst [vmem:[%s3155_s25 + $0xb8] sm:$0xff] %v1442_v6 }
 0x14a   : > { %1498 = vst [vmem:[%s3155_s25 + $0xa8] sm:$0xff] %v1434_v48 }
 0x160   : > { %v1891_v23 = vpop.f32.mrb[8].mxu0 }
 0x161   : > { %v1391_v9 = vadd.f32 %v1891_v23, %v3151_v54  ;;  %v1382_v22 = vpop.f32.mrb[9].mxu0 }
 0x162   : > { %v1383_v31 = vadd.f32 %v3151_v54, %v1382_v22  ;;  %v1892_v20 = vpop.f32.mrb[10].mxu0 }
 0x163   : > { %1487 = vst [vmem:[%s3155_s25 + $0x50] sm:$0xff] %v1391_v9  ;;  %v1394_v45 = vadd.f32 %v1892_v20, %v3151_v54  ;;  %v1385_v51 = vpop.f32.mrb[11].mxu0 }
 0x164   : > { %1485 = vst [vmem:[%s3155_s25 + $0x40] sm:$0xff] %v1383_v31  ;;  %v1386_v36 = vadd.f32 %v3151_v54, %v1385_v51 }
 0x165   : > { %1488 = vst [vmem:[%s3155_s25 + $0x58] sm:$0xff] %v1394_v45 }
 0x166   : > { %1486 = vst [vmem:[%s3155_s25 + $0x48] sm:$0xff] %v1386_v36 }
 0x169   : > { %v1907_v24 = vpop.f32.mrb[8].mxu1 }
 0x16a   : > { %v1455_v28 = vadd.f32 %v1907_v24, %v3151_v54  ;;  %v1446_v30 = vpop.f32.mrb[9].mxu1 }
 0x16b   : > { %v1447_v47 = vadd.f32 %v3151_v54, %v1446_v30  ;;  %v1908_v14 = vpop.f32.mrb[10].mxu1 }
 0x16c   : > { %1503 = vst [vmem:[%s3155_s25 + $0xd0] sm:$0xff] %v1455_v28  ;;  %v1458_v19 = vadd.f32 %v1908_v14, %v3151_v54  ;;  %v1449_v60 = vpop.f32.mrb[11].mxu1 }
 0x16d   : > { %1501 = vst [vmem:[%s3155_s25 + $0xc0] sm:$0xff] %v1447_v47  ;;  %v1450_v5 = vadd.f32 %v3151_v54, %v1449_v60 }
 0x16e   : > { %1504 = vst [vmem:[%s3155_s25 + $0xd8] sm:$0xff] %v1458_v19 }
 0x16f   : > { %1502 = vst [vmem:[%s3155_s25 + $0xc8] sm:$0xff] %v1450_v5 }
 0x185   : > { %v1895_v42 = vpop.f32.mrb[12].mxu0 }
 0x186   : > { %v1407_v25 = vadd.f32 %v1895_v42, %v3151_v54  ;;  %v1398_v3 = vpop.f32.mrb[13].mxu0 }
 0x187   : > { %v1399_v33 = vadd.f32 %v3151_v54, %v1398_v3  ;;  %v1896_v8 = vpop.f32.mrb[14].mxu0 }
 0x188   : > { %1491 = vst [vmem:[%s3155_s25 + $0x70] sm:$0xff] %v1407_v25  ;;  %v1410_v59 = vadd.f32 %v1896_v8, %v3151_v54  ;;  %v1401_v58 = vpop.f32.mrb[15].mxu0 }
 0x189   : > { %1489 = vst [vmem:[%s3155_s25 + $0x60] sm:$0xff] %v1399_v33  ;;  %v1402_v53 = vadd.f32 %v3151_v54, %v1401_v58 }
 0x18a   : > { %1492 = vst [vmem:[%s3155_s25 + $0x78] sm:$0xff] %v1410_v59 }
 0x18b   : > { %1490 = vst [vmem:[%s3155_s25 + $0x68] sm:$0xff] %v1402_v53 }
 0x18e   : > { %v1911_v26 = vpop.f32.mrb[12].mxu1 }
 0x18f   : > { %v1471_v34 = vadd.f32 %v1911_v26, %v3151_v54  ;;  %v1462_v55 = vpop.f32.mrb[13].mxu1 }
 0x190   : > { %v1463_v43 = vadd.f32 %v3151_v54, %v1462_v55  ;;  %v1912_v29 = vpop.f32.mrb[14].mxu1 }
 0x191   : > { %1507 = vst [vmem:[%s3155_s25 + $0xf0] sm:$0xff] %v1471_v34  ;;  %v1474_v16 = vadd.f32 %v1912_v29, %v3151_v54  ;;  %v1465_v49 = vpop.f32.mrb[15].mxu1 }
 0x192   : > { %1505 = vst [vmem:[%s3155_s25 + $0xe0] sm:$0xff] %v1463_v43  ;;  %v1466_v1 = vadd.f32 %v3151_v54, %v1465_v49 }
 0x193   : > { %1508 = vst [vmem:[%s3155_s25 + $0xf8] sm:$0xff] %v1474_v16 }
 0x194   : > { %1506 = vst [vmem:[%s3155_s25 + $0xe8] sm:$0xff] %v1466_v1 }
 0x195   : > { %1998 = shalt.err (!%p1995_p5)
}
 0x196   : > { %s1999_s14 = scalar_lea.hbm %s3220_s9, 4096  ;;  %s2003_s17 = scalar_lea.hbm %s3281_s5, 8192 }
 0x197   : > { %p2000_p6 = scmp.ne.s32.totalorder %s3220_s9, %s1999_s14  ;;  %p2004_p10 = scmp.lt.u32.totalorder %s3220_s9, %s3281_s5 }
 0x198   : > { %p2005_p11 = scmp.lt.u32.totalorder %s2003_s17, %s1999_s14  ;;  %p2007_p13 = scmp.lt.u32.totalorder %s1999_s14, %s3220_s9 }
 0x199   : > { %p2001_p7 = pnand %p2000_p6, %p2138_p4 }
 0x19a   : > { %p2006_p12 = por %p2005_p11, %p2004_p10 }
 0x19b   : > { %p2002_p9 = pneg %p2001_p7 }
 0x19c   : > { %p2008_p0 = por %p2007_p13, %p2006_p12 }
 0x19e   : > { %p2009_p1 = pnand %p2008_p0, %p2002_p9 }
 0x1a0   : > { %2012 = shalt.err (!%p2009_p1)
}
 0x1a1   : > { %s2066_s27 = smov 128   ;;  %s2067_s7 = smov 8  }
 0x1a2   : > { %1922 = dma.vmem_to_hbm [thread:$0]  (%p2138_p4), %s3222_s29, 4096, %s3220_s9, %s3230_s21, %s2066_s27, %s2066_s27, %s2067_s7  }
 0x1a3 PF: > { %p1928_p2 = scmp.ge.s32.totalorder %s2063_s23, 2  ;;  %s1539_s8 = sand.u32 1, %s2043_s18  }
 0x1a4   : > { %s1540_s10 = scalar_lea.sflag [#allocation3], %s1539_s8 }
 0x1a5   : > { %p1925_p3 = pnand %p1928_p2, %p2145_p8 }
 0x1a7   : > { %2038 = dma.done.wait (!%p1925_p3), %s1540_s10, 4096  }
 0x1a8   : > { %2040 = vsyncadd (!%p1925_p3), %s1540_s10, 4294963200  ;;  %s18_s23 = sadd.s32 1, %s2063_s23   ;;  %s3284_s18 = smov %s2047_s19 }
 0x1a9   : > { %p15_p5 = scmp.ge.s32.totalorder %s18_s23, 4   ;;  %s3285_s19 = smov %s2051_s20 }
 0x1aa   : > { %s3286_s20 = smov %s2151_s6  ;;  %s3287_s21 = smov %s2059_s22 }
 0x1ab   : > { %s3288_s22 = smov %s3290_s26  ;;  %17 = sbr.rel (!%p15_p5) target bundleno = 4 (0x4), region = 83 }
 0x1b2   :  { %1545 = vsyncpa [#allocation3], 1 }
 0x1b3   :  { %1547 = vsyncpa [#allocation3 + $0x1], 1 }

</bundles_post_ra>
